<compile_context>
chip_gen: v7x
topology: tpu7x:2x2x1
jax: 0.10.0
libtpu: 0.0.40
codegen_flags: <defaults>
</compile_context>

<pallas_src>
import jax
import jax.numpy as jnp
from jax.experimental import pallas as pl
from jax.experimental.pallas import tpu as pltpu

# vgg19_bn configuration 'E'
_CFG = [64, 64, 'M', 128, 128, 'M', 256, 256, 256, 256, 'M',
        512, 512, 512, 512, 'M', 512, 512, 512, 512, 'M']
FEATURE_DIM = 128   # stand-in for config.style_extractor.feature_dim
BN_EPS = 1e-5

_COUT_TILE = None


def _preferred_cout_tile():
    """256-lane output tiles fill the 256-wide MXU on v6e/v7x; 128 elsewhere."""
    global _COUT_TILE
    if _COUT_TILE is None:
        try:
            kind = jax.devices()[0].device_kind.lower()
        except Exception:
            kind = ""
        _COUT_TILE = 256 if any(t in kind for t in ("v6", "v7", "7x")) else 128
    return _COUT_TILE


# ----------------------------------------------------------------------------
# Pallas kernels
# ----------------------------------------------------------------------------
def _conv_block(x, w2d, b, *, pool, build_taps):
    """Fused conv(+BN folded)+ReLU(+2x2 maxpool) block, batch folded into M.

    build_taps=True : x is (N,H,W,Cin); the kernel builds the (N*H*W, 9*Cin)
                      im2col buffer in a VMEM scratch at co==0 and reuses it.
    build_taps=False: x is already im2col'ed to (N,H,W,K) (stem, K=27).
    w2d: (K, Cout) bf16 with row index dy*3*Cin + dx*Cin + c.  b: (1,Cout) f32.
    """
    N, H, W, K_in = x.shape
    K, Cout = w2d.shape
    if build_taps:
        assert K == 9 * K_in
    else:
        assert K == K_in
    CO = min(Cout, _preferred_cout_tile())
    n_co = Cout // CO
    Ho, Wo = (H // 2, W // 2) if pool else (H, W)
    if pool:
        assert H % 2 == 0 and W % 2 == 0
    M = N * H * W
    C3 = 3 * K_in

    def kernel(x_ref, w_ref, b_ref, o_ref, *scratch):
        if build_taps:
            col_ref = scratch[0]

            # Build the im2col buffer once per layer; reuse it for co > 0.
            @pl.when(pl.program_id(0) == 0)
            def _build():
                xb = x_ref[...]                                        # (N,H,W,Cin)
                zc = jnp.zeros((N, H, 1, K_in), xb.dtype)
                left = jnp.concatenate([zc, xb[:, :, :W - 1, :]], axis=2)   # x-1
                right = jnp.concatenate([xb[:, :, 1:, :], zc], axis=2)      # x+1
                dxb = jnp.concatenate([left, xb, right], axis=3)            # (N,H,W,3Cin)
                zr = jnp.zeros((N, 1, W, C3), xb.dtype)
                up = jnp.concatenate([zr, dxb[:, :H - 1]], axis=1)          # y-1
                down = jnp.concatenate([dxb[:, 1:], zr], axis=1)            # y+1
                col_ref[:, 0:C3] = up.reshape(M, C3)                        # dy=0
                col_ref[:, C3:2 * C3] = dxb.reshape(M, C3)                  # dy=1
                col_ref[:, 2 * C3:3 * C3] = down.reshape(M, C3)             # dy=2

            lhs = col_ref[...]
        else:
            lhs = x_ref[...].reshape(M, K)

        # Single MXU matmul with K = 9*Cin; folded-BN bias + ReLU once at end.
        acc = jnp.dot(lhs, w_ref[...], preferred_element_type=jnp.float32)  # (M,CO)
        out = jnp.maximum(acc + b_ref[...], 0.0).reshape(N, H, W, CO)
        if pool:
            # Fused MaxPool2d(2,2): cheap major-dim (H) pair max first, then W.
            out = out.reshape(N, H // 2, 2, W, CO).max(axis=2)
            out = out.reshape(N, H // 2, W // 2, 2, CO).max(axis=3)
        o_ref[...] = out.astype(o_ref.dtype)

    scratch_shapes = [pltpu.VMEM((M, K), x.dtype)] if build_taps else []

    return pl.pallas_call(
        kernel,
        out_shape=jax.ShapeDtypeStruct((N, Ho, Wo, Cout), x.dtype),
        grid=(n_co,),
        in_specs=[
            pl.BlockSpec((N, H, W, K_in), lambda co: (0, 0, 0, 0)),
            pl.BlockSpec((K, CO), lambda co: (0, co)),
            pl.BlockSpec((1, CO), lambda co: (0, co)),
        ],
        out_specs=pl.BlockSpec((N, Ho, Wo, CO), lambda co: (0, 0, 0, co)),
        scratch_shapes=scratch_shapes,
        # "arbitrary": the im2col scratch is carried across Cout tiles, so the
        # axis must stay on one core (matters on v7x megacore).
        compiler_params=pltpu.CompilerParams(
            dimension_semantics=("arbitrary",)),
    )(x, w2d, b)


def _im2col3x3(x):
    """Plain-JAX glue, stem only (Cin=3 -> K=27; ~100 KB at this input size).
    Channel order (dy, dx, c) matches w2d row ordering."""
    N, H, W, C = x.shape
    xp = jnp.pad(x, ((0, 0), (1, 1), (1, 1), (0, 0)))
    cols = [xp[:, dy:dy + H, dx:dx + W, :] for dy in range(3) for dx in range(3)]
    return jnp.concatenate(cols, axis=-1)


def conv3x3_bn_relu(x, w2d, b, *, pool=False):
    """x: (N,H,W,Cin) bf16; w2d: (9*Cin, Cout) bf16 (BN-folded); b: (1,Cout) f32."""
    Cin = x.shape[-1]
    if 9 * Cin <= 128:
        # Stem: tiny XLA-side im2col, single K=27 matmul in the kernel.
        return _conv_block(_im2col3x3(x), w2d, b, pool=pool, build_taps=False)
    return _conv_block(x, w2d, b, pool=pool, build_taps=True)


def head_forward(x, w1, b1, w2, b2):
    """AdaptiveAvgPool2d((1,1)) + view(N,-1) + Linear(512,256)
    + Dropout(0.5) [identity, eval] + Linear(256, FEATURE_DIM) -> (N, F) f32."""
    N, H, W, C = x.shape
    Dh = w1.shape[1]
    F = w2.shape[1]

    def kernel(x_ref, w1_ref, b1_ref, w2_ref, b2_ref, o_ref):
        feat = jnp.mean(x_ref[...].astype(jnp.float32), axis=(1, 2))   # (N, C)
        h = jnp.dot(feat.astype(jnp.bfloat16), w1_ref[...],
                    preferred_element_type=jnp.float32) + b1_ref[...]
        # nn.Dropout(p=0.5) is the identity in eval/inference mode.
        o_ref[...] = jnp.dot(h.astype(jnp.bfloat16), w2_ref[...],
                             preferred_element_type=jnp.float32) + b2_ref[...]

    return pl.pallas_call(
        kernel,
        out_shape=jax.ShapeDtypeStruct((N, F), jnp.float32),
        grid=(1,),
        in_specs=[
            pl.BlockSpec((N, H, W, C), lambda i: (0, 0, 0, 0)),
            pl.BlockSpec((C, Dh), lambda i: (0, 0)),
            pl.BlockSpec((1, Dh), lambda i: (0, 0)),
            pl.BlockSpec((Dh, F), lambda i: (0, 0)),
            pl.BlockSpec((1, F), lambda i: (0, 0)),
        ],
        out_specs=pl.BlockSpec((N, F), lambda i: (0, 0)),
    )(x, w1, b1, w2, b2)


# ----------------------------------------------------------------------------
# Parameter setup (glue, plain JAX) — deterministic synthetic weights.
# ----------------------------------------------------------------------------
def init_params(key, feature_dim=FEATURE_DIM):
    layers = []
    in_c = 3
    for v in _CFG:
        if v == 'M':
            layers[-1]['pool'] = True          # fuse pool into preceding conv
            continue
        key, kw, kb, kg, kbe, km, kv = jax.random.split(key, 7)
        # PyTorch shapes: conv weight (Cout, Cin, 3, 3), bias (Cout,), BN params (Cout,)
        w = jax.random.normal(kw, (v, in_c, 3, 3), jnp.float32) * (0.2 / float(in_c * 9) ** 0.5)
        b = 0.01 * jax.random.normal(kb, (v,), jnp.float32)
        gamma = 1.0 + 0.1 * jax.random.normal(kg, (v,), jnp.float32)
        beta = 0.01 * jax.random.normal(kbe, (v,), jnp.float32)
        rmean = 0.01 * jax.random.normal(km, (v,), jnp.float32)
        rvar = 1.0 + 0.1 * jax.random.uniform(kv, (v,), jnp.float32)
        # Fold eval-mode BatchNorm into the conv (in f32, then cast to bf16).
        scale = gamma / jnp.sqrt(rvar + BN_EPS)                 # (Cout,)
        w_f = w * scale[:, None, None, None]
        b_f = (b - rmean) * scale + beta
        # (Cout,Cin,3,3) -> (dy,dx,Cin,Cout) -> (9*Cin, Cout); row = dy*3*Cin+dx*Cin+c
        w2d = jnp.transpose(w_f, (2, 3, 1, 0)).reshape(9 * in_c, v).astype(jnp.bfloat16)
        layers.append({'w': w2d, 'b': b_f.reshape(1, v), 'pool': False})
        in_c = v

    key, k1, k2, k3, k4 = jax.random.split(key, 5)
    w1 = jax.random.normal(k1, (256, 512), jnp.float32) * (1.0 / 512 ** 0.5)   # torch (out,in)
    b1 = 0.01 * jax.random.normal(k2, (256,), jnp.float32)
    w2 = jax.random.normal(k3, (feature_dim, 256), jnp.float32) * (1.0 / 256 ** 0.5)
    b2 = 0.01 * jax.random.normal(k4, (feature_dim,), jnp.float32)
    head = (jnp.transpose(w1).astype(jnp.bfloat16), b1.reshape(1, 256),
            jnp.transpose(w2).astype(jnp.bfloat16), b2.reshape(1, feature_dim))
    return {'features': layers, 'head': head}


# ----------------------------------------------------------------------------
# Forward pass (VGG19.forward)
# ----------------------------------------------------------------------------
def vgg19_forward(params, x_nchw):
    # layout: input follows PyTorch NCHW; kernels run NHWC in bf16 (f32 accumulate).
    x = jnp.transpose(x_nchw, (0, 2, 3, 1)).astype(jnp.bfloat16)
    for layer in params['features']:
        x = conv3x3_bn_relu(x, layer['w'], layer['b'], pool=layer['pool'])
    # avgpool(1,1) + flatten + Linear(512,256) + Dropout(eval=id) + Linear(256,F)
    return head_forward(x, *params['head'])


if __name__ == "__main__":
    key = jax.random.PRNGKey(0)
    kp, kx = jax.random.split(key)
    params = init_params(kp)
    # Small input consistent with vgg19_bn (3 input channels, 5 halvings -> 32x32 min).
    x = jax.random.normal(kx, (2, 3, 32, 32), jnp.float32)
    out = vgg19_forward(params, x)
    out = jax.block_until_ready(out)
    assert out.shape == (2, FEATURE_DIM), out.shape
    assert out.dtype == jnp.float32
    print("KERNEL_OK")
</pallas_src>

<mosaic_0001>
module attributes {stable_mosaic.version = 11 : i64} {
  func.func @kernel(%arg0: i32, %arg1: memref<2x32x32x27xbf16, #tpu.memory_space<vmem>>, %arg2: memref<27x64xbf16, #tpu.memory_space<vmem>>, %arg3: memref<1x64xf32, #tpu.memory_space<vmem>>, %arg4: memref<2x32x32x64xbf16, #tpu.memory_space<vmem>>) attributes {dimension_semantics = [#tpu.dimension_semantics<arbitrary>], iteration_bounds = array<i64: 1>, scalar_prefetch = 0 : i64, scratch_operands = 0 : i64, tpu.core_type = #tpu.core_type<tc>, window_params = [{pipeline_mode = #tpu.pipeline_mode<synchronous>, transform_indices = @transform_0, window_bounds = array<i64: 2, 32, 32, 27>}, {transform_indices = @transform_1, window_bounds = array<i64: 27, 64>}, {transform_indices = @transform_2, window_bounds = array<i64: 1, 64>}, {transform_indices = @transform_3, window_bounds = array<i64: 2, 32, 32, 64>}]} {
    %c0 = arith.constant 0 : index
    %c0_0 = arith.constant 0 : index
    %c0_1 = arith.constant 0 : index
    %c0_2 = arith.constant 0 : index
    %0 = vector.load %arg1[%c0, %c0_0, %c0_1, %c0_2] : memref<2x32x32x27xbf16, #tpu.memory_space<vmem>>, vector<2x32x32x27xbf16>
    %1 = vector.shape_cast %0 : vector<2x32x32x27xbf16> to vector<2048x27xbf16>
    %c0_3 = arith.constant 0 : index
    %c0_4 = arith.constant 0 : index
    %2 = vector.load %arg2[%c0_3, %c0_4] : memref<27x64xbf16, #tpu.memory_space<vmem>>, vector<27x64xbf16>
    %cst = arith.constant dense<0.000000e+00> : vector<2048x64xf32>
    %3 = tpu.matmul %1, %2, %cst {dimension_numbers = #tpu.dot_dimension_numbers<[1], [0], [0], [1], [0, 0, 1, 1], [], []>} : vector<2048x27xbf16>, vector<27x64xbf16>, vector<2048x64xf32> -> vector<2048x64xf32>
    %c0_5 = arith.constant 0 : index
    %c0_6 = arith.constant 0 : index
    %4 = vector.load %arg3[%c0_5, %c0_6] : memref<1x64xf32, #tpu.memory_space<vmem>>, vector<1x64xf32>
    %5 = vector.broadcast %4 : vector<1x64xf32> to vector<2048x64xf32>
    %6 = arith.addf %3, %5 : vector<2048x64xf32>
    %cst_7 = arith.constant 0.000000e+00 : f32
    %7 = vector.broadcast %cst_7 : f32 to vector<2048x64xf32>
    %8 = arith.maximumf %6, %7 : vector<2048x64xf32>
    %9 = vector.shape_cast %8 : vector<2048x64xf32> to vector<2x32x32x64xf32>
    %10 = arith.truncf %9 : vector<2x32x32x64xf32> to vector<2x32x32x64xbf16>
    %c0_8 = arith.constant 0 : index
    %c0_9 = arith.constant 0 : index
    %c0_10 = arith.constant 0 : index
    %c0_11 = arith.constant 0 : index
    %11 = vector.load %arg4[%c0_8, %c0_9, %c0_10, %c0_11] : memref<2x32x32x64xbf16, #tpu.memory_space<vmem>>, vector<2x32x32x64xbf16>
    tpu.vector_store %arg4[%c0_8, %c0_9, %c0_10, %c0_11], %10 {strides = array<i32>} : memref<2x32x32x64xbf16, #tpu.memory_space<vmem>>, vector<2x32x32x64xbf16>,
    return
  }
  func.func @transform_0(%arg0: i32) -> (i32, i32, i32, i32) {
    %c0_i32 = arith.constant 0 : i32
    %c0_i32_0 = arith.constant 0 : i32
    %c0_i32_1 = arith.constant 0 : i32
    %c0_i32_2 = arith.constant 0 : i32
    %c0_i32_3 = arith.constant 0 : i32
    return %c0_i32, %c0_i32_0, %c0_i32_1, %c0_i32_2 : i32, i32, i32, i32
  }
  func.func @transform_1(%arg0: i32) -> (i32, i32) {
    %c0_i32 = arith.constant 0 : i32
    %c0_i32_0 = arith.constant 0 : i32
    return %c0_i32, %arg0 : i32, i32
  }
  func.func @transform_2(%arg0: i32) -> (i32, i32) {
    %c0_i32 = arith.constant 0 : i32
    %c0_i32_0 = arith.constant 0 : i32
    return %c0_i32, %arg0 : i32, i32
  }
  func.func @transform_3(%arg0: i32) -> (i32, i32, i32, i32) {
    %c0_i32 = arith.constant 0 : i32
    %c0_i32_0 = arith.constant 0 : i32
    %c0_i32_1 = arith.constant 0 : i32
    %c0_i32_2 = arith.constant 0 : i32
    return %c0_i32, %c0_i32_0, %c0_i32_1, %arg0 : i32, i32, i32, i32
  }
}

</mosaic_0001>

<bundles_post_ra>
// kernel: tpu_custom_call.1
= control target key start
LH: loop header
LB: loop body
LE: loop exit
PB: predicated region body
PF: predicated region fallthrough
CT: control target
= control target key end

     0   :  { %vm1319_vm0 = vcmask 1044480   ;;  %vm1320_vm1 = vcmask 1045504   ;;  %v5261_v2 = vmov 65535   ;;  %vm934_vm2 = vcmask 220160   ;;  %s6342_s0 = inlined_call_operand.vmem [shape: bf16[2,32,32,27], index: 0, kind: input, shape index: {}]   ;;  %s6343_s1 = inlined_call_operand.vmem [shape: bf16[27,64], index: 1, kind: input, shape index: {}]   ;;  %s6344_s2 = inlined_call_operand.vmem [shape: f32[1,64], index: 2, kind: input, shape index: {}]   ;;  %s6345_s3 = inlined_call_operand.hbm [shape: bf16[2,32,32,64], index: 3, kind: output, shape index: {}]  }
   0x1   :  { %v5105_v0 = vld [vmem:[%s6343_s1] sm:$0xff]   ;;  %v5106_v1 = vld [vmem:[%s6343_s1 + $0x8] sm:$0x3f]   ;;  %v1321_v3 = vsel %vm1319_vm0, 4294967295, %v5261_v2  ;;  %v5111_v10 = vld [vmem:[%s6342_s0 + $0x10] sm:$0xff]  }
   0x2   :  { %4837 = vmatprep.subr.bf16.mxu0 %v5105_v0  ;;  %5097 = vmatprep.subr.bf16.mxu1 %v5105_v0  ;;  %v5107_v4 = vld [vmem:[%s6342_s0] sm:$0xff]   ;;  %v1322_v6 = vsel %vm1320_vm1, %v1321_v3, 0  ;;  %v5109_v8 = vld [vmem:[%s6342_s0 + $0x8] sm:$0xff]   ;;  %v5112_v11 = vld [vmem:[%s6342_s0 + $0x210] sm:$0xff]  }
   0x3   :  { %4838 = vmatpush3.bf16.msra.mxu0 %v5105_v0  ;;  %5099 = vmatpush3.bf16.msra.mxu1 %v5105_v0  ;;  %v5108_v5 = vld [vmem:[%s6342_s0 + $0x200] sm:$0xff]   ;;  %v1324_v7 = vand.u32 %v5106_v1, %v1322_v6  ;;  %v5110_v9 = vld [vmem:[%s6342_s0 + $0x208] sm:$0xff]   ;;  %v5113_v12 = vld [vmem:[%s6342_s0 + $0x18] sm:$0xff]  }
   0x4   :  { %4841 = vmatprep.mubr.msk.bf16.mxu0 %vm934_vm2, %v5107_v4  ;;  %4969 = vmatprep.mubr.msk.bf16.mxu1 %vm934_vm2, %v5108_v5  ;;  %v5114_v13 = vld [vmem:[%s6342_s0 + $0x218] sm:$0xff]   ;;  %v5115_v14 = vld [vmem:[%s6342_s0 + $0x20] sm:$0xff]   ;;  %v5117_v16 = vld [vmem:[%s6342_s0 + $0x28] sm:$0xff]  }
   0x5   :  { %4839 = vmatprep.subr.bf16.mxu0 %v1324_v7  ;;  %5098 = vmatprep.subr.bf16.mxu1 %v1324_v7  ;;  %v5116_v15 = vld [vmem:[%s6342_s0 + $0x220] sm:$0xff]   ;;  %v5118_v17 = vld [vmem:[%s6342_s0 + $0x228] sm:$0xff]   ;;  %v5119_v18 = vld [vmem:[%s6342_s0 + $0x30] sm:$0xff]  }
   0x6   :  { %v5120_v19 = vld [vmem:[%s6342_s0 + $0x230] sm:$0xff]   ;;  %v5121_v20 = vld [vmem:[%s6342_s0 + $0x38] sm:$0xff]   ;;  %v5123_v22 = vld [vmem:[%s6342_s0 + $0x40] sm:$0xff]  }
   0x7   :  { %4840 = vmatpush3.bf16.msra.mxu0 %v1324_v7  ;;  %5100 = vmatpush3.bf16.msra.mxu1 %v1324_v7  ;;  %v5122_v21 = vld [vmem:[%s6342_s0 + $0x238] sm:$0xff]   ;;  %v5124_v23 = vld [vmem:[%s6342_s0 + $0x240] sm:$0xff]   ;;  %v5125_v24 = vld [vmem:[%s6342_s0 + $0x48] sm:$0xff]  }
   0x8   :  { %v5126_v25 = vld [vmem:[%s6342_s0 + $0x248] sm:$0xff]   ;;  %v5127_v26 = vld [vmem:[%s6342_s0 + $0x50] sm:$0xff]   ;;  %v5129_v28 = vld [vmem:[%s6342_s0 + $0x58] sm:$0xff]  }
   0x9   :  { %v5128_v27 = vld [vmem:[%s6342_s0 + $0x250] sm:$0xff]   ;;  %v5130_v29 = vld [vmem:[%s6342_s0 + $0x258] sm:$0xff]   ;;  %v5131_v30 = vld [vmem:[%s6342_s0 + $0x60] sm:$0xff]  }
   0xa   :  { %4842 = vmatmul.mubr.msk.bf16.vlgmr.msra.gmra.mrb[0].mxu0 %vm934_vm2, %v5109_v8  ;;  %4970 = vmatmul.mubr.msk.bf16.vlgmr.msra.gmra.mrb[0].mxu1 %vm934_vm2, %v5110_v9  ;;  %v5132_v31 = vld [vmem:[%s6342_s0 + $0x260] sm:$0xff]   ;;  %v5133_v32 = vld [vmem:[%s6342_s0 + $0x68] sm:$0xff]   ;;  %v5135_v34 = vld [vmem:[%s6342_s0 + $0x70] sm:$0xff]  }
   0xb   :  { %4845 = vmatprep.mubr.msk.bf16.mxu0 %vm934_vm2, %v5111_v10  ;;  %4973 = vmatprep.mubr.msk.bf16.mxu1 %vm934_vm2, %v5112_v11  ;;  %v5134_v33 = vld [vmem:[%s6342_s0 + $0x268] sm:$0xff]   ;;  %v5136_v35 = vld [vmem:[%s6342_s0 + $0x270] sm:$0xff]   ;;  %v5137_v36 = vld [vmem:[%s6342_s0 + $0x78] sm:$0xff]  }
   0xc   :  { %v5138_v37 = vld [vmem:[%s6342_s0 + $0x278] sm:$0xff]   ;;  %v5139_v38 = vld [vmem:[%s6342_s0 + $0x80] sm:$0xff]   ;;  %v5141_v40 = vld [vmem:[%s6342_s0 + $0x88] sm:$0xff]  }
   0xd   :  { %v5140_v39 = vld [vmem:[%s6342_s0 + $0x280] sm:$0xff]   ;;  %v5142_v41 = vld [vmem:[%s6342_s0 + $0x288] sm:$0xff]   ;;  %v5143_v42 = vld [vmem:[%s6342_s0 + $0x90] sm:$0xff]  }
   0xe   :  { %v5144_v43 = vld [vmem:[%s6342_s0 + $0x290] sm:$0xff]   ;;  %v5145_v44 = vld [vmem:[%s6342_s0 + $0x98] sm:$0xff]   ;;  %v5147_v46 = vld [vmem:[%s6342_s0 + $0xa0] sm:$0xff]  }
   0xf   :  { %v5146_v45 = vld [vmem:[%s6342_s0 + $0x298] sm:$0xff]   ;;  %v5148_v47 = vld [vmem:[%s6342_s0 + $0x2a0] sm:$0xff]   ;;  %v5149_v48 = vld [vmem:[%s6342_s0 + $0xa8] sm:$0xff]  }
  0x10   :  { %v5150_v49 = vld [vmem:[%s6342_s0 + $0x2a8] sm:$0xff]   ;;  %v5151_v50 = vld [vmem:[%s6342_s0 + $0xb0] sm:$0xff]   ;;  %v5153_v52 = vld [vmem:[%s6342_s0 + $0xb8] sm:$0xff]  }
  0x11   :  { %v5152_v51 = vld [vmem:[%s6342_s0 + $0x2b0] sm:$0xff]   ;;  %v5154_v53 = vld [vmem:[%s6342_s0 + $0x2b8] sm:$0xff]   ;;  %v5155_v54 = vld [vmem:[%s6342_s0 + $0xc0] sm:$0xff]  }
  0x12   :  { %4846 = vmatmul.mubr.msk.bf16.gmra.mrb[4].mxu0 %vm934_vm2, %v5113_v12  ;;  %4974 = vmatmul.mubr.msk.bf16.gmra.mrb[4].mxu1 %vm934_vm2, %v5114_v13  ;;  %v5156_v55 = vld [vmem:[%s6342_s0 + $0x2c0] sm:$0xff]   ;;  %v5157_v56 = vld [vmem:[%s6342_s0 + $0xc8] sm:$0xff]   ;;  %v5159_v58 = vld [vmem:[%s6342_s0 + $0xd0] sm:$0xff]  }
  0x13   :  { %4849 = vmatprep.mubr.msk.bf16.mxu0 %vm934_vm2, %v5115_v14  ;;  %4977 = vmatprep.mubr.msk.bf16.mxu1 %vm934_vm2, %v5116_v15  ;;  %v5158_v57 = vld [vmem:[%s6342_s0 + $0x2c8] sm:$0xff]   ;;  %v5160_v59 = vld [vmem:[%s6342_s0 + $0x2d0] sm:$0xff]   ;;  %v5161_v60 = vld [vmem:[%s6342_s0 + $0xd8] sm:$0xff]  }
  0x14   :  { %v5162_v61 = vld [vmem:[%s6342_s0 + $0x2d8] sm:$0xff]   ;;  %v5163_v62 = vld [vmem:[%s6342_s0 + $0xe0] sm:$0xff]   ;;  %v5165_v0 = vld [vmem:[%s6342_s0 + $0xe8] sm:$0xff]  }
  0x15   :  { %v5164_v63 = vld [vmem:[%s6342_s0 + $0x2e0] sm:$0xff]   ;;  %v5166_v1 = vld [vmem:[%s6342_s0 + $0x2e8] sm:$0xff]   ;;  %v5167_v2 = vld [vmem:[%s6342_s0 + $0xf0] sm:$0xff]  }
  0x16   :  { %v5168_v3 = vld [vmem:[%s6342_s0 + $0x2f0] sm:$0xff]   ;;  %v5169_v4 = vld [vmem:[%s6342_s0 + $0xf8] sm:$0xff]   ;;  %v5171_v6 = vld [vmem:[%s6342_s0 + $0x100] sm:$0xff]  }
  0x17   :  { %v5170_v5 = vld [vmem:[%s6342_s0 + $0x2f8] sm:$0xff]   ;;  %v5172_v7 = vld [vmem:[%s6342_s0 + $0x300] sm:$0xff]  }
  0x1a   :  { %4850 = vmatmul.mubr.msk.bf16.gmra.mrb[8].mxu0 %vm934_vm2, %v5117_v16  ;;  %4978 = vmatmul.mubr.msk.bf16.gmra.mrb[8].mxu1 %vm934_vm2, %v5118_v17 }
  0x1b   :  { %4853 = vmatprep.mubr.msk.bf16.mxu0 %vm934_vm2, %v5119_v18  ;;  %4981 = vmatprep.mubr.msk.bf16.mxu1 %vm934_vm2, %v5120_v19 }
  0x22   :  { %4854 = vmatmul.mubr.msk.bf16.gmra.mrb[12].mxu0 %vm934_vm2, %v5121_v20  ;;  %4982 = vmatmul.mubr.msk.bf16.gmra.mrb[12].mxu1 %vm934_vm2, %v5122_v21 }
  0x23   :  { %4857 = vmatprep.mubr.msk.bf16.mxu0 %vm934_vm2, %v5123_v22  ;;  %4985 = vmatprep.mubr.msk.bf16.mxu1 %vm934_vm2, %v5124_v23 }
  0x2a   :  { %4858 = vmatmul.mubr.msk.bf16.gmra.mrb[16].mxu0 %vm934_vm2, %v5125_v24  ;;  %4986 = vmatmul.mubr.msk.bf16.gmra.mrb[16].mxu1 %vm934_vm2, %v5126_v25 }
  0x2b   :  { %4861 = vmatprep.mubr.msk.bf16.mxu0 %vm934_vm2, %v5127_v26  ;;  %4989 = vmatprep.mubr.msk.bf16.mxu1 %vm934_vm2, %v5128_v27 }
  0x32   :  { %4862 = vmatmul.mubr.msk.bf16.gmra.mrb[20].mxu0 %vm934_vm2, %v5129_v28  ;;  %4990 = vmatmul.mubr.msk.bf16.gmra.mrb[20].mxu1 %vm934_vm2, %v5130_v29 }
  0x33   :  { %4865 = vmatprep.mubr.msk.bf16.mxu0 %vm934_vm2, %v5131_v30  ;;  %4993 = vmatprep.mubr.msk.bf16.mxu1 %vm934_vm2, %v5132_v31 }
  0x3a   :  { %4866 = vmatmul.mubr.msk.bf16.gmra.mrb[24].mxu0 %vm934_vm2, %v5133_v32  ;;  %4994 = vmatmul.mubr.msk.bf16.gmra.mrb[24].mxu1 %vm934_vm2, %v5134_v33 }
  0x3b   :  { %4869 = vmatprep.mubr.msk.bf16.mxu0 %vm934_vm2, %v5135_v34  ;;  %4997 = vmatprep.mubr.msk.bf16.mxu1 %vm934_vm2, %v5136_v35 }
  0x42   :  { %4870 = vmatmul.mubr.msk.bf16.gmra.mrb[28].mxu0 %vm934_vm2, %v5137_v36  ;;  %4998 = vmatmul.mubr.msk.bf16.gmra.mrb[28].mxu1 %vm934_vm2, %v5138_v37 }
  0x43   :  { %4873 = vmatprep.mubr.msk.bf16.mxu0 %vm934_vm2, %v5139_v38  ;;  %5001 = vmatprep.mubr.msk.bf16.mxu1 %vm934_vm2, %v5140_v39 }
  0x4a   :  { %4874 = vmatmul.mubr.msk.bf16.gmra.mrb[32].mxu0 %vm934_vm2, %v5141_v40  ;;  %5002 = vmatmul.mubr.msk.bf16.gmra.mrb[32].mxu1 %vm934_vm2, %v5142_v41 }
  0x4b   :  { %4877 = vmatprep.mubr.msk.bf16.mxu0 %vm934_vm2, %v5143_v42  ;;  %5005 = vmatprep.mubr.msk.bf16.mxu1 %vm934_vm2, %v5144_v43 }
  0x52   :  { %4878 = vmatmul.mubr.msk.bf16.gmra.mrb[36].mxu0 %vm934_vm2, %v5145_v44  ;;  %5006 = vmatmul.mubr.msk.bf16.gmra.mrb[36].mxu1 %vm934_vm2, %v5146_v45 }
  0x53   :  { %4881 = vmatprep.mubr.msk.bf16.mxu0 %vm934_vm2, %v5147_v46  ;;  %5009 = vmatprep.mubr.msk.bf16.mxu1 %vm934_vm2, %v5148_v47 }
  0x5a   :  { %4882 = vmatmul.mubr.msk.bf16.gmra.mrb[40].mxu0 %vm934_vm2, %v5149_v48  ;;  %5010 = vmatmul.mubr.msk.bf16.gmra.mrb[40].mxu1 %vm934_vm2, %v5150_v49 }
  0x5b   :  { %4885 = vmatprep.mubr.msk.bf16.mxu0 %vm934_vm2, %v5151_v50  ;;  %5013 = vmatprep.mubr.msk.bf16.mxu1 %vm934_vm2, %v5152_v51 }
  0x62   :  { %4886 = vmatmul.mubr.msk.bf16.gmra.mrb[44].mxu0 %vm934_vm2, %v5153_v52  ;;  %5014 = vmatmul.mubr.msk.bf16.gmra.mrb[44].mxu1 %vm934_vm2, %v5154_v53 }
  0x63   :  { %4889 = vmatprep.mubr.msk.bf16.mxu0 %vm934_vm2, %v5155_v54  ;;  %5017 = vmatprep.mubr.msk.bf16.mxu1 %vm934_vm2, %v5156_v55 }
  0x6a   :  { %4890 = vmatmul.mubr.msk.bf16.gmra.mrb[48].mxu0 %vm934_vm2, %v5157_v56  ;;  %5018 = vmatmul.mubr.msk.bf16.gmra.mrb[48].mxu1 %vm934_vm2, %v5158_v57 }
  0x6b   :  { %4893 = vmatprep.mubr.msk.bf16.mxu0 %vm934_vm2, %v5159_v58  ;;  %5021 = vmatprep.mubr.msk.bf16.mxu1 %vm934_vm2, %v5160_v59 }
  0x72   :  { %4894 = vmatmul.mubr.msk.bf16.gmra.mrb[52].mxu0 %vm934_vm2, %v5161_v60  ;;  %5022 = vmatmul.mubr.msk.bf16.gmra.mrb[52].mxu1 %vm934_vm2, %v5162_v61 }
  0x73   :  { %4897 = vmatprep.mubr.msk.bf16.mxu0 %vm934_vm2, %v5163_v62  ;;  %5025 = vmatprep.mubr.msk.bf16.mxu1 %vm934_vm2, %v5164_v63 }
  0x7a   :  { %4898 = vmatmul.mubr.msk.bf16.gmra.mrb[56].mxu0 %vm934_vm2, %v5165_v0  ;;  %5026 = vmatmul.mubr.msk.bf16.gmra.mrb[56].mxu1 %vm934_vm2, %v5166_v1 }
  0x7b   :  { %4901 = vmatprep.mubr.msk.bf16.mxu0 %vm934_vm2, %v5167_v2  ;;  %5029 = vmatprep.mubr.msk.bf16.mxu1 %vm934_vm2, %v5168_v3 }
  0x7c   :  { %8 = vsyncpa [#allocation3], 0  ;;  %v5173_v8 = vld [vmem:[%s6342_s0 + $0x108] sm:$0xff]   ;;  %v5175_v10 = vld [vmem:[%s6342_s0 + $0x110] sm:$0xff]   ;;  %vm3663_vm3 = vcmask 519168  }
  0x7d   :  { %v5174_v9 = vld [vmem:[%s6342_s0 + $0x308] sm:$0xff]   ;;  %v5176_v11 = vld [vmem:[%s6342_s0 + $0x310] sm:$0xff]   ;;  %v5177_v12 = vld [vmem:[%s6342_s0 + $0x118] sm:$0xff]  }
  0x7e   :  { %v5178_v13 = vld [vmem:[%s6342_s0 + $0x318] sm:$0xff]   ;;  %v5179_v14 = vld [vmem:[%s6342_s0 + $0x120] sm:$0xff]   ;;  %v5181_v16 = vld [vmem:[%s6342_s0 + $0x128] sm:$0xff]  }
  0x7f   :  { %v5180_v15 = vld [vmem:[%s6342_s0 + $0x320] sm:$0xff]   ;;  %v5182_v17 = vld [vmem:[%s6342_s0 + $0x328] sm:$0xff]   ;;  %v5183_v18 = vld [vmem:[%s6342_s0 + $0x130] sm:$0xff]  }
  0x80   :  { %v5184_v19 = vld [vmem:[%s6342_s0 + $0x330] sm:$0xff]   ;;  %v5185_v20 = vld [vmem:[%s6342_s0 + $0x138] sm:$0xff]   ;;  %v5187_v22 = vld [vmem:[%s6342_s0 + $0x140] sm:$0xff]  }
  0x81   :  { %v5186_v21 = vld [vmem:[%s6342_s0 + $0x338] sm:$0xff]   ;;  %v5188_v23 = vld [vmem:[%s6342_s0 + $0x340] sm:$0xff]   ;;  %v5189_v24 = vld [vmem:[%s6342_s0 + $0x148] sm:$0xff]  }
  0x82   :  { %4902 = vmatmul.mubr.msk.bf16.gmra.mrb[60].mxu0 %vm934_vm2, %v5169_v4  ;;  %5030 = vmatmul.mubr.msk.bf16.gmra.mrb[60].mxu1 %vm934_vm2, %v5170_v5  ;;  %v5190_v25 = vld [vmem:[%s6342_s0 + $0x348] sm:$0xff]   ;;  %v5191_v26 = vld [vmem:[%s6342_s0 + $0x150] sm:$0xff]   ;;  %v5193_v28 = vld [vmem:[%s6342_s0 + $0x158] sm:$0xff]  }
  0x83   :  { %4905 = vmatprep.mubr.msk.bf16.mxu0 %vm934_vm2, %v5171_v6  ;;  %5033 = vmatprep.mubr.msk.bf16.mxu1 %vm934_vm2, %v5172_v7  ;;  %v5192_v27 = vld [vmem:[%s6342_s0 + $0x350] sm:$0xff]   ;;  %v5194_v29 = vld [vmem:[%s6342_s0 + $0x358] sm:$0xff]   ;;  %v5195_v30 = vld [vmem:[%s6342_s0 + $0x160] sm:$0xff]  }
  0x84   :  { %v5196_v31 = vld [vmem:[%s6342_s0 + $0x360] sm:$0xff]   ;;  %v5197_v32 = vld [vmem:[%s6342_s0 + $0x168] sm:$0xff]   ;;  %v5199_v34 = vld [vmem:[%s6342_s0 + $0x170] sm:$0xff]  }
  0x85   :  { %v5198_v33 = vld [vmem:[%s6342_s0 + $0x368] sm:$0xff]   ;;  %v5200_v35 = vld [vmem:[%s6342_s0 + $0x370] sm:$0xff]   ;;  %v5201_v36 = vld [vmem:[%s6342_s0 + $0x178] sm:$0xff]  }
  0x86   :  { %v5202_v37 = vld [vmem:[%s6342_s0 + $0x378] sm:$0xff]   ;;  %v5203_v38 = vld [vmem:[%s6342_s0 + $0x180] sm:$0xff]   ;;  %v5205_v40 = vld [vmem:[%s6342_s0 + $0x188] sm:$0xff]  }
  0x87   :  { %v5204_v39 = vld [vmem:[%s6342_s0 + $0x380] sm:$0xff]   ;;  %v5206_v41 = vld [vmem:[%s6342_s0 + $0x388] sm:$0xff]   ;;  %v5207_v42 = vld [vmem:[%s6342_s0 + $0x190] sm:$0xff]  }
  0x88   :  { %v5208_v43 = vld [vmem:[%s6342_s0 + $0x390] sm:$0xff]   ;;  %v5209_v44 = vld [vmem:[%s6342_s0 + $0x198] sm:$0xff]   ;;  %v5211_v46 = vld [vmem:[%s6342_s0 + $0x1a0] sm:$0xff]  }
  0x89   :  { %v5210_v45 = vld [vmem:[%s6342_s0 + $0x398] sm:$0xff]   ;;  %v5212_v47 = vld [vmem:[%s6342_s0 + $0x3a0] sm:$0xff]   ;;  %v5213_v48 = vld [vmem:[%s6342_s0 + $0x1a8] sm:$0xff]  }
  0x8a   :  { %4906 = vmatmul.mubr.msk.bf16.gmra.mrb[64].mxu0 %vm934_vm2, %v5173_v8  ;;  %5034 = vmatmul.mubr.msk.bf16.gmra.mrb[64].mxu1 %vm934_vm2, %v5174_v9  ;;  %v5214_v49 = vld [vmem:[%s6342_s0 + $0x3a8] sm:$0xff]   ;;  %v5215_v50 = vld [vmem:[%s6342_s0 + $0x1b0] sm:$0xff]   ;;  %v5732_v52 = vld [vmem:[%s6344_s2] ss:$0 sm:$0xff] }
  0x8b   :  { %4909 = vmatprep.mubr.msk.bf16.mxu0 %vm934_vm2, %v5175_v10  ;;  %5037 = vmatprep.mubr.msk.bf16.mxu1 %vm934_vm2, %v5176_v11  ;;  %v5216_v51 = vld [vmem:[%s6342_s0 + $0x3b0] sm:$0xff]   ;;  %v5217_v59 = vld [vmem:[%s6342_s0 + $0x1b8] sm:$0xff]   ;;  %v5219_v1 = vld [vmem:[%s6342_s0 + $0x1c0] sm:$0xff]  }
  0x8c   :  { %v5218_v60 = vld [vmem:[%s6342_s0 + $0x3b8] sm:$0xff]   ;;  %v5220_v2 = vld [vmem:[%s6342_s0 + $0x3c0] sm:$0xff]  }
  0x92   :  { %4910 = vmatmul.mubr.msk.bf16.gmra.mrb[68].mxu0 %vm934_vm2, %v5177_v12  ;;  %5038 = vmatmul.mubr.msk.bf16.gmra.mrb[68].mxu1 %vm934_vm2, %v5178_v13 }
  0x93   :  { %4913 = vmatprep.mubr.msk.bf16.mxu0 %vm934_vm2, %v5179_v14  ;;  %5041 = vmatprep.mubr.msk.bf16.mxu1 %vm934_vm2, %v5180_v15 }
  0x9a   :  { %4914 = vmatmul.mubr.msk.bf16.gmra.mrb[72].mxu0 %vm934_vm2, %v5181_v16  ;;  %5042 = vmatmul.mubr.msk.bf16.gmra.mrb[72].mxu1 %vm934_vm2, %v5182_v17 }
  0x9b   :  { %4917 = vmatprep.mubr.msk.bf16.mxu0 %vm934_vm2, %v5183_v18  ;;  %5045 = vmatprep.mubr.msk.bf16.mxu1 %vm934_vm2, %v5184_v19 }
  0xa2   :  { %4918 = vmatmul.mubr.msk.bf16.gmra.mrb[76].mxu0 %vm934_vm2, %v5185_v20  ;;  %5046 = vmatmul.mubr.msk.bf16.gmra.mrb[76].mxu1 %vm934_vm2, %v5186_v21 }
  0xa3   :  { %4921 = vmatprep.mubr.msk.bf16.mxu0 %vm934_vm2, %v5187_v22  ;;  %5049 = vmatprep.mubr.msk.bf16.mxu1 %vm934_vm2, %v5188_v23 }
  0xaa   :  { %4922 = vmatmul.mubr.msk.bf16.gmra.mrb[80].mxu0 %vm934_vm2, %v5189_v24  ;;  %5050 = vmatmul.mubr.msk.bf16.gmra.mrb[80].mxu1 %vm934_vm2, %v5190_v25 }
  0xab   :  { %4925 = vmatprep.mubr.msk.bf16.mxu0 %vm934_vm2, %v5191_v26  ;;  %5053 = vmatprep.mubr.msk.bf16.mxu1 %vm934_vm2, %v5192_v27 }
  0xb2   :  { %4926 = vmatmul.mubr.msk.bf16.gmra.mrb[84].mxu0 %vm934_vm2, %v5193_v28  ;;  %5054 = vmatmul.mubr.msk.bf16.gmra.mrb[84].mxu1 %vm934_vm2, %v5194_v29 }
  0xb3   :  { %4929 = vmatprep.mubr.msk.bf16.mxu0 %vm934_vm2, %v5195_v30  ;;  %5057 = vmatprep.mubr.msk.bf16.mxu1 %vm934_vm2, %v5196_v31  ;;  %v5221_v31 = vld [vmem:[%s6342_s0 + $0x1c8] sm:$0xff]  }
  0xba   :  { %4930 = vmatmul.mubr.msk.bf16.gmra.mrb[88].mxu0 %vm934_vm2, %v5197_v32  ;;  %5058 = vmatmul.mubr.msk.bf16.gmra.mrb[88].mxu1 %vm934_vm2, %v5198_v33  ;;  %v5222_v32 = vld [vmem:[%s6342_s0 + $0x3c8] sm:$0xff]  }
  0xbb   :  { %4933 = vmatprep.mubr.msk.bf16.mxu0 %vm934_vm2, %v5199_v34  ;;  %5061 = vmatprep.mubr.msk.bf16.mxu1 %vm934_vm2, %v5200_v35 }
  0xc2   :  { %4934 = vmatmul.mubr.msk.bf16.gmra.mrb[92].mxu0 %vm934_vm2, %v5201_v36  ;;  %5062 = vmatmul.mubr.msk.bf16.gmra.mrb[92].mxu1 %vm934_vm2, %v5202_v37  ;;  %v5223_v37 = vld [vmem:[%s6342_s0 + $0x1d0] sm:$0xff]  }
  0xc3   :  { %4937 = vmatprep.mubr.msk.bf16.mxu0 %vm934_vm2, %v5203_v38  ;;  %5065 = vmatprep.mubr.msk.bf16.mxu1 %vm934_vm2, %v5204_v39  ;;  %v5224_v38 = vld [vmem:[%s6342_s0 + $0x3d0] sm:$0xff]  }
  0xca   :  { %4938 = vmatmul.mubr.msk.bf16.gmra.mrb[96].mxu0 %vm934_vm2, %v5205_v40  ;;  %5066 = vmatmul.mubr.msk.bf16.gmra.mrb[96].mxu1 %vm934_vm2, %v5206_v41 }
  0xcb   :  { %4941 = vmatprep.mubr.msk.bf16.mxu0 %vm934_vm2, %v5207_v42  ;;  %5069 = vmatprep.mubr.msk.bf16.mxu1 %vm934_vm2, %v5208_v43 }
  0xd2   :  { %4942 = vmatmul.mubr.msk.bf16.gmra.mrb[100].mxu0 %vm934_vm2, %v5209_v44  ;;  %5070 = vmatmul.mubr.msk.bf16.gmra.mrb[100].mxu1 %vm934_vm2, %v5210_v45 }
  0xd3   :  { %4945 = vmatprep.mubr.msk.bf16.mxu0 %vm934_vm2, %v5211_v46  ;;  %5073 = vmatprep.mubr.msk.bf16.mxu1 %vm934_vm2, %v5212_v47 }
  0xda   :  { %4946 = vmatmul.mubr.msk.bf16.gmra.mrb[104].mxu0 %vm934_vm2, %v5213_v48  ;;  %5074 = vmatmul.mubr.msk.bf16.gmra.mrb[104].mxu1 %vm934_vm2, %v5214_v49 }
  0xdb   :  { %4949 = vmatprep.mubr.msk.bf16.mxu0 %vm934_vm2, %v5215_v50  ;;  %5077 = vmatprep.mubr.msk.bf16.mxu1 %vm934_vm2, %v5216_v51 }
  0xdd   :  { %v4843_v53 = vpop.f32.mrb[0].mxu0  ;;  %v4971_v54 = vpop.f32.mrb[0].mxu1 }
  0xde   :  { %v1369_v55 = vadd.f32 %v4843_v53, %v5732_v52  ;;  %v1881_v56 = vadd.f32 %v4971_v54, %v5732_v52  ;;  %v1360_v57 = vpop.f32.mrb[1].mxu0  ;;  %v1872_v58 = vpop.f32.mrb[1].mxu1 }
  0xdf   :  { %v1361_v61 = vadd.f32 %v5732_v52, %v1360_v57  ;;  %v1873_v62 = vadd.f32 %v5732_v52, %v1872_v58  ;;  %v4844_v63 = vpop.f32.mrb[2].mxu0  ;;  %v4972_v0 = vpop.f32.mrb[2].mxu1 }
  0xe0   :  { %v2385_v3 = vmax.f32 %v1369_v55, 0.0  ;;  %v2513_v4 = vmax.f32 %v1881_v56, 0.0  ;;  %v1372_v5 = vadd.f32 %v4844_v63, %v5732_v52  ;;  %v1884_v6 = vadd.f32 %v4972_v0, %v5732_v52  ;;  %v1363_v7 = vpop.f32.mrb[3].mxu0  ;;  %v1875_v8 = vpop.f32.mrb[3].mxu1 }
  0xe1   :  { %v2383_v9 = vmax.f32 %v1361_v61, 0.0  ;;  %v2511_v10 = vmax.f32 %v1873_v62, 0.0  ;;  %v1364_v11 = vadd.f32 %v5732_v52, %v1363_v7  ;;  %v1876_v12 = vadd.f32 %v5732_v52, %v1875_v8 }
  0xe2   :  { %v4453_v13 = vpack.c.bf16 %v2385_v3, %v2385_v3  ;;  %v4581_v14 = vpack.c.bf16 %v2513_v4, %v2513_v4  ;;  %v2386_v15 = vmax.f32 %v1372_v5, 0.0  ;;  %v2514_v16 = vmax.f32 %v1884_v6, 0.0  ;;  %4950 = vmatmul.mubr.msk.bf16.gmra.mrb[108].mxu0 %vm934_vm2, %v5217_v59  ;;  %5078 = vmatmul.mubr.msk.bf16.gmra.mrb[108].mxu1 %vm934_vm2, %v5218_v60  ;;  %v5225_v4 = vld [vmem:[%s6342_s0 + $0x1d8] sm:$0xff]  }
  0xe3   :  { %v4451_v17 = vpack.c.bf16 %v2383_v9, %v2383_v9  ;;  %v4579_v18 = vpack.c.bf16 %v2511_v10, %v2511_v10  ;;  %v2384_v19 = vmax.f32 %v1364_v11, 0.0  ;;  %v2512_v20 = vmax.f32 %v1876_v12, 0.0  ;;  %4953 = vmatprep.mubr.msk.bf16.mxu0 %vm934_vm2, %v5219_v1  ;;  %5081 = vmatprep.mubr.msk.bf16.mxu1 %vm934_vm2, %v5220_v2  ;;  %v5226_v5 = vld [vmem:[%s6342_s0 + $0x3d8] sm:$0xff]   ;;  %v5227_v10 = vld [vmem:[%s6342_s0 + $0x1e0] sm:$0xff]  }
  0xe4   :  { %3666 = vst.msk [vmem:[#allocation2 + $0x8] sm:$0xf] %vm3663_vm3, %v4453_v13  ;;  %3794 = vst.msk [vmem:[#allocation2 + $0x208] sm:$0xf] %vm3663_vm3, %v4581_v14  ;;  %v4454_v21 = vpack.c.bf16 %v2386_v15, %v2386_v15  ;;  %v4582_v22 = vpack.c.bf16 %v2514_v16, %v2514_v16  ;;  %v5228_v11 = vld [vmem:[%s6342_s0 + $0x3e0] sm:$0xff]  }
  0xe5   :  { %3664 = vst.msk [vmem:[#allocation2] sm:$0xf] %vm3663_vm3, %v4451_v17  ;;  %3792 = vst.msk [vmem:[#allocation2 + $0x200] sm:$0xf] %vm3663_vm3, %v4579_v18  ;;  %v4452_v23 = vpack.c.bf16 %v2384_v19, %v2384_v19  ;;  %v4580_v24 = vpack.c.bf16 %v2512_v20, %v2512_v20  ;;  %v4847_v25 = vpop.f32.mrb[4].mxu0  ;;  %v4975_v26 = vpop.f32.mrb[4].mxu1 }
  0xe6   :  { %3667 = vst.msk [vmem:[#allocation2 + $0xc] sm:$0xf] %vm3663_vm3, %v4454_v21  ;;  %3795 = vst.msk [vmem:[#allocation2 + $0x20c] sm:$0xf] %vm3663_vm3, %v4582_v22  ;;  %v1385_v27 = vadd.f32 %v4847_v25, %v5732_v52  ;;  %v1897_v28 = vadd.f32 %v4975_v26, %v5732_v52  ;;  %v1376_v29 = vpop.f32.mrb[5].mxu0  ;;  %v1888_v30 = vpop.f32.mrb[5].mxu1 }
  0xe7   :  { %3665 = vst.msk [vmem:[#allocation2 + $0x4] sm:$0xf] %vm3663_vm3, %v4452_v23  ;;  %3793 = vst.msk [vmem:[#allocation2 + $0x204] sm:$0xf] %vm3663_vm3, %v4580_v24  ;;  %v1377_v33 = vadd.f32 %v5732_v52, %v1376_v29  ;;  %v1889_v34 = vadd.f32 %v5732_v52, %v1888_v30  ;;  %v4848_v35 = vpop.f32.mrb[6].mxu0  ;;  %v4976_v36 = vpop.f32.mrb[6].mxu1 }
  0xe8   :  { %v2389_v39 = vmax.f32 %v1385_v27, 0.0  ;;  %v2517_v40 = vmax.f32 %v1897_v28, 0.0  ;;  %v1388_v41 = vadd.f32 %v4848_v35, %v5732_v52  ;;  %v1900_v42 = vadd.f32 %v4976_v36, %v5732_v52  ;;  %v1379_v43 = vpop.f32.mrb[7].mxu0  ;;  %v1891_v44 = vpop.f32.mrb[7].mxu1 }
  0xe9   :  { %v2387_v45 = vmax.f32 %v1377_v33, 0.0  ;;  %v2515_v46 = vmax.f32 %v1889_v34, 0.0  ;;  %v1380_v47 = vadd.f32 %v5732_v52, %v1379_v43  ;;  %v1892_v48 = vadd.f32 %v5732_v52, %v1891_v44 }
  0xea   :  { %v4457_v49 = vpack.c.bf16 %v2389_v39, %v2389_v39  ;;  %v4585_v50 = vpack.c.bf16 %v2517_v40, %v2517_v40  ;;  %v2390_v51 = vmax.f32 %v1388_v41, 0.0  ;;  %v2518_v53 = vmax.f32 %v1900_v42, 0.0  ;;  %4954 = vmatmul.mubr.msk.bf16.gmra.mrb[112].mxu0 %vm934_vm2, %v5221_v31  ;;  %5082 = vmatmul.mubr.msk.bf16.gmra.mrb[112].mxu1 %vm934_vm2, %v5222_v32  ;;  %v5229_v40 = vld [vmem:[%s6342_s0 + $0x1e8] sm:$0xff]  }
  0xeb   :  { %v4455_v54 = vpack.c.bf16 %v2387_v45, %v2387_v45  ;;  %v4583_v55 = vpack.c.bf16 %v2515_v46, %v2515_v46  ;;  %v2388_v56 = vmax.f32 %v1380_v47, 0.0  ;;  %v2516_v57 = vmax.f32 %v1892_v48, 0.0  ;;  %4957 = vmatprep.mubr.msk.bf16.mxu0 %vm934_vm2, %v5223_v37  ;;  %5085 = vmatprep.mubr.msk.bf16.mxu1 %vm934_vm2, %v5224_v38  ;;  %v5230_v41 = vld [vmem:[%s6342_s0 + $0x3e8] sm:$0xff]   ;;  %v5231_v46 = vld [vmem:[%s6342_s0 + $0x1f0] sm:$0xff]  }
  0xec   :  { %3670 = vst.msk [vmem:[#allocation2 + $0x18] sm:$0xf] %vm3663_vm3, %v4457_v49  ;;  %3798 = vst.msk [vmem:[#allocation2 + $0x218] sm:$0xf] %vm3663_vm3, %v4585_v50  ;;  %v4458_v58 = vpack.c.bf16 %v2390_v51, %v2390_v51  ;;  %v4586_v59 = vpack.c.bf16 %v2518_v53, %v2518_v53  ;;  %v5232_v47 = vld [vmem:[%s6342_s0 + $0x3f0] sm:$0xff]  }
  0xed   :  { %3668 = vst.msk [vmem:[#allocation2 + $0x10] sm:$0xf] %vm3663_vm3, %v4455_v54  ;;  %3796 = vst.msk [vmem:[#allocation2 + $0x210] sm:$0xf] %vm3663_vm3, %v4583_v55  ;;  %v4456_v60 = vpack.c.bf16 %v2388_v56, %v2388_v56  ;;  %v4584_v61 = vpack.c.bf16 %v2516_v57, %v2516_v57  ;;  %v4851_v62 = vpop.f32.mrb[8].mxu0  ;;  %v4979_v63 = vpop.f32.mrb[8].mxu1 }
  0xee   :  { %3671 = vst.msk [vmem:[#allocation2 + $0x1c] sm:$0xf] %vm3663_vm3, %v4458_v58  ;;  %3799 = vst.msk [vmem:[#allocation2 + $0x21c] sm:$0xf] %vm3663_vm3, %v4586_v59  ;;  %v1401_v0 = vadd.f32 %v4851_v62, %v5732_v52  ;;  %v1913_v1 = vadd.f32 %v4979_v63, %v5732_v52  ;;  %v1392_v2 = vpop.f32.mrb[9].mxu0  ;;  %v1904_v3 = vpop.f32.mrb[9].mxu1 }
  0xef   :  { %3669 = vst.msk [vmem:[#allocation2 + $0x14] sm:$0xf] %vm3663_vm3, %v4456_v60  ;;  %3797 = vst.msk [vmem:[#allocation2 + $0x214] sm:$0xf] %vm3663_vm3, %v4584_v61  ;;  %v1393_v6 = vadd.f32 %v5732_v52, %v1392_v2  ;;  %v1905_v7 = vadd.f32 %v5732_v52, %v1904_v3  ;;  %v4852_v8 = vpop.f32.mrb[10].mxu0  ;;  %v4980_v9 = vpop.f32.mrb[10].mxu1 }
  0xf0   :  { %v2393_v12 = vmax.f32 %v1401_v0, 0.0  ;;  %v2521_v13 = vmax.f32 %v1913_v1, 0.0  ;;  %v1404_v14 = vadd.f32 %v4852_v8, %v5732_v52  ;;  %v1916_v15 = vadd.f32 %v4980_v9, %v5732_v52  ;;  %v1395_v16 = vpop.f32.mrb[11].mxu0  ;;  %v1907_v17 = vpop.f32.mrb[11].mxu1 }
  0xf1   :  { %v2391_v18 = vmax.f32 %v1393_v6, 0.0  ;;  %v2519_v19 = vmax.f32 %v1905_v7, 0.0  ;;  %v1396_v20 = vadd.f32 %v5732_v52, %v1395_v16  ;;  %v1908_v21 = vadd.f32 %v5732_v52, %v1907_v17 }
  0xf2   :  { %v4461_v22 = vpack.c.bf16 %v2393_v12, %v2393_v12  ;;  %v4589_v23 = vpack.c.bf16 %v2521_v13, %v2521_v13  ;;  %v2394_v24 = vmax.f32 %v1404_v14, 0.0  ;;  %v2522_v25 = vmax.f32 %v1916_v15, 0.0  ;;  %4958 = vmatmul.mubr.msk.bf16.gmra.mrb[116].mxu0 %vm934_vm2, %v5225_v4  ;;  %5086 = vmatmul.mubr.msk.bf16.gmra.mrb[116].mxu1 %vm934_vm2, %v5226_v5  ;;  %v5233_v13 = vld [vmem:[%s6342_s0 + $0x1f8] sm:$0xff]  }
  0xf3   :  { %v4459_v26 = vpack.c.bf16 %v2391_v18, %v2391_v18  ;;  %v4587_v27 = vpack.c.bf16 %v2519_v19, %v2519_v19  ;;  %v2392_v28 = vmax.f32 %v1396_v20, 0.0  ;;  %v2520_v29 = vmax.f32 %v1908_v21, 0.0  ;;  %4961 = vmatprep.mubr.msk.bf16.mxu0 %vm934_vm2, %v5227_v10  ;;  %5089 = vmatprep.mubr.msk.bf16.mxu1 %vm934_vm2, %v5228_v11  ;;  %v5234_v14 = vld [vmem:[%s6342_s0 + $0x3f8] sm:$0xff]  }
  0xf4   :  { %3674 = vst.msk [vmem:[#allocation2 + $0x28] sm:$0xf] %vm3663_vm3, %v4461_v22  ;;  %3802 = vst.msk [vmem:[#allocation2 + $0x228] sm:$0xf] %vm3663_vm3, %v4589_v23  ;;  %v4462_v30 = vpack.c.bf16 %v2394_v24, %v2394_v24  ;;  %v4590_v31 = vpack.c.bf16 %v2522_v25, %v2522_v25 }
  0xf5   :  { %3672 = vst.msk [vmem:[#allocation2 + $0x20] sm:$0xf] %vm3663_vm3, %v4459_v26  ;;  %3800 = vst.msk [vmem:[#allocation2 + $0x220] sm:$0xf] %vm3663_vm3, %v4587_v27  ;;  %v4460_v32 = vpack.c.bf16 %v2392_v28, %v2392_v28  ;;  %v4588_v33 = vpack.c.bf16 %v2520_v29, %v2520_v29  ;;  %v4855_v34 = vpop.f32.mrb[12].mxu0  ;;  %v4983_v35 = vpop.f32.mrb[12].mxu1 }
  0xf6   :  { %3675 = vst.msk [vmem:[#allocation2 + $0x2c] sm:$0xf] %vm3663_vm3, %v4462_v30  ;;  %3803 = vst.msk [vmem:[#allocation2 + $0x22c] sm:$0xf] %vm3663_vm3, %v4590_v31  ;;  %v1417_v36 = vadd.f32 %v4855_v34, %v5732_v52  ;;  %v1929_v37 = vadd.f32 %v4983_v35, %v5732_v52  ;;  %v1408_v38 = vpop.f32.mrb[13].mxu0  ;;  %v1920_v39 = vpop.f32.mrb[13].mxu1 }
  0xf7   :  { %3673 = vst.msk [vmem:[#allocation2 + $0x24] sm:$0xf] %vm3663_vm3, %v4460_v32  ;;  %3801 = vst.msk [vmem:[#allocation2 + $0x224] sm:$0xf] %vm3663_vm3, %v4588_v33  ;;  %v1409_v42 = vadd.f32 %v5732_v52, %v1408_v38  ;;  %v1921_v43 = vadd.f32 %v5732_v52, %v1920_v39  ;;  %v4856_v44 = vpop.f32.mrb[14].mxu0  ;;  %v4984_v45 = vpop.f32.mrb[14].mxu1 }
  0xf8   :  { %v2397_v48 = vmax.f32 %v1417_v36, 0.0  ;;  %v2525_v49 = vmax.f32 %v1929_v37, 0.0  ;;  %v1420_v50 = vadd.f32 %v4856_v44, %v5732_v52  ;;  %v1932_v51 = vadd.f32 %v4984_v45, %v5732_v52  ;;  %v1411_v53 = vpop.f32.mrb[15].mxu0  ;;  %v1923_v54 = vpop.f32.mrb[15].mxu1 }
  0xf9   :  { %v2395_v55 = vmax.f32 %v1409_v42, 0.0  ;;  %v2523_v56 = vmax.f32 %v1921_v43, 0.0  ;;  %v1412_v57 = vadd.f32 %v5732_v52, %v1411_v53  ;;  %v1924_v58 = vadd.f32 %v5732_v52, %v1923_v54 }
  0xfa   :  { %v4465_v59 = vpack.c.bf16 %v2397_v48, %v2397_v48  ;;  %v4593_v60 = vpack.c.bf16 %v2525_v49, %v2525_v49  ;;  %v2398_v61 = vmax.f32 %v1420_v50, 0.0  ;;  %v2526_v62 = vmax.f32 %v1932_v51, 0.0  ;;  %4962 = vmatmul.mubr.msk.bf16.gmra.mrb[120].mxu0 %vm934_vm2, %v5229_v40  ;;  %5090 = vmatmul.mubr.msk.bf16.gmra.mrb[120].mxu1 %vm934_vm2, %v5230_v41 }
  0xfb   :  { %v4463_v63 = vpack.c.bf16 %v2395_v55, %v2395_v55  ;;  %v4591_v0 = vpack.c.bf16 %v2523_v56, %v2523_v56  ;;  %v2396_v1 = vmax.f32 %v1412_v57, 0.0  ;;  %v2524_v2 = vmax.f32 %v1924_v58, 0.0  ;;  %4965 = vmatprep.mubr.msk.bf16.mxu0 %vm934_vm2, %v5231_v46  ;;  %5093 = vmatprep.mubr.msk.bf16.mxu1 %vm934_vm2, %v5232_v47 }
  0xfc   :  { %3678 = vst.msk [vmem:[#allocation2 + $0x38] sm:$0xf] %vm3663_vm3, %v4465_v59  ;;  %3806 = vst.msk [vmem:[#allocation2 + $0x238] sm:$0xf] %vm3663_vm3, %v4593_v60  ;;  %v4466_v3 = vpack.c.bf16 %v2398_v61, %v2398_v61  ;;  %v4594_v4 = vpack.c.bf16 %v2526_v62, %v2526_v62 }
  0xfd   :  { %3676 = vst.msk [vmem:[#allocation2 + $0x30] sm:$0xf] %vm3663_vm3, %v4463_v63  ;;  %3804 = vst.msk [vmem:[#allocation2 + $0x230] sm:$0xf] %vm3663_vm3, %v4591_v0  ;;  %v4464_v5 = vpack.c.bf16 %v2396_v1, %v2396_v1  ;;  %v4592_v6 = vpack.c.bf16 %v2524_v2, %v2524_v2  ;;  %v4859_v7 = vpop.f32.mrb[16].mxu0  ;;  %v4987_v8 = vpop.f32.mrb[16].mxu1 }
  0xfe   :  { %3679 = vst.msk [vmem:[#allocation2 + $0x3c] sm:$0xf] %vm3663_vm3, %v4466_v3  ;;  %3807 = vst.msk [vmem:[#allocation2 + $0x23c] sm:$0xf] %vm3663_vm3, %v4594_v4  ;;  %v1433_v9 = vadd.f32 %v4859_v7, %v5732_v52  ;;  %v1945_v10 = vadd.f32 %v4987_v8, %v5732_v52  ;;  %v1424_v11 = vpop.f32.mrb[17].mxu0  ;;  %v1936_v12 = vpop.f32.mrb[17].mxu1 }
  0xff   :  { %3677 = vst.msk [vmem:[#allocation2 + $0x34] sm:$0xf] %vm3663_vm3, %v4464_v5  ;;  %3805 = vst.msk [vmem:[#allocation2 + $0x234] sm:$0xf] %vm3663_vm3, %v4592_v6  ;;  %v1425_v15 = vadd.f32 %v5732_v52, %v1424_v11  ;;  %v1937_v16 = vadd.f32 %v5732_v52, %v1936_v12  ;;  %v4860_v17 = vpop.f32.mrb[18].mxu0  ;;  %v4988_v18 = vpop.f32.mrb[18].mxu1 }
 0x100   :  { %v2401_v19 = vmax.f32 %v1433_v9, 0.0  ;;  %v2529_v20 = vmax.f32 %v1945_v10, 0.0  ;;  %v1436_v21 = vadd.f32 %v4860_v17, %v5732_v52  ;;  %v1948_v22 = vadd.f32 %v4988_v18, %v5732_v52  ;;  %v1427_v23 = vpop.f32.mrb[19].mxu0  ;;  %v1939_v24 = vpop.f32.mrb[19].mxu1 }
 0x101   :  { %v2399_v25 = vmax.f32 %v1425_v15, 0.0  ;;  %v2527_v26 = vmax.f32 %v1937_v16, 0.0  ;;  %v1428_v27 = vadd.f32 %v5732_v52, %v1427_v23  ;;  %v1940_v28 = vadd.f32 %v5732_v52, %v1939_v24 }
 0x102   :  { %v4469_v29 = vpack.c.bf16 %v2401_v19, %v2401_v19  ;;  %v4597_v30 = vpack.c.bf16 %v2529_v20, %v2529_v20  ;;  %v2402_v31 = vmax.f32 %v1436_v21, 0.0  ;;  %v2530_v32 = vmax.f32 %v1948_v22, 0.0  ;;  %4966 = vmatmul.mubr.msk.bf16.gmra.mrb[124].mxu0 %vm934_vm2, %v5233_v13  ;;  %5094 = vmatmul.mubr.msk.bf16.gmra.mrb[124].mxu1 %vm934_vm2, %v5234_v14 }
 0x103   :  { %v4467_v33 = vpack.c.bf16 %v2399_v25, %v2399_v25  ;;  %v4595_v34 = vpack.c.bf16 %v2527_v26, %v2527_v26  ;;  %v2400_v35 = vmax.f32 %v1428_v27, 0.0  ;;  %v2528_v36 = vmax.f32 %v1940_v28, 0.0 }
 0x104   :  { %3682 = vst.msk [vmem:[#allocation2 + $0x48] sm:$0xf] %vm3663_vm3, %v4469_v29  ;;  %3810 = vst.msk [vmem:[#allocation2 + $0x248] sm:$0xf] %vm3663_vm3, %v4597_v30  ;;  %v4470_v37 = vpack.c.bf16 %v2402_v31, %v2402_v31  ;;  %v4598_v38 = vpack.c.bf16 %v2530_v32, %v2530_v32 }
 0x105   :  { %3680 = vst.msk [vmem:[#allocation2 + $0x40] sm:$0xf] %vm3663_vm3, %v4467_v33  ;;  %3808 = vst.msk [vmem:[#allocation2 + $0x240] sm:$0xf] %vm3663_vm3, %v4595_v34  ;;  %v4468_v39 = vpack.c.bf16 %v2400_v35, %v2400_v35  ;;  %v4596_v40 = vpack.c.bf16 %v2528_v36, %v2528_v36  ;;  %v4863_v41 = vpop.f32.mrb[20].mxu0  ;;  %v4991_v42 = vpop.f32.mrb[20].mxu1 }
 0x106   :  { %3683 = vst.msk [vmem:[#allocation2 + $0x4c] sm:$0xf] %vm3663_vm3, %v4470_v37  ;;  %3811 = vst.msk [vmem:[#allocation2 + $0x24c] sm:$0xf] %vm3663_vm3, %v4598_v38  ;;  %v1449_v43 = vadd.f32 %v4863_v41, %v5732_v52  ;;  %v1961_v44 = vadd.f32 %v4991_v42, %v5732_v52  ;;  %v1440_v45 = vpop.f32.mrb[21].mxu0  ;;  %v1952_v46 = vpop.f32.mrb[21].mxu1 }
 0x107   :  { %3681 = vst.msk [vmem:[#allocation2 + $0x44] sm:$0xf] %vm3663_vm3, %v4468_v39  ;;  %3809 = vst.msk [vmem:[#allocation2 + $0x244] sm:$0xf] %vm3663_vm3, %v4596_v40  ;;  %v1441_v47 = vadd.f32 %v5732_v52, %v1440_v45  ;;  %v1953_v48 = vadd.f32 %v5732_v52, %v1952_v46  ;;  %v4864_v49 = vpop.f32.mrb[22].mxu0  ;;  %v4992_v50 = vpop.f32.mrb[22].mxu1 }
 0x108   :  { %v2405_v51 = vmax.f32 %v1449_v43, 0.0  ;;  %v2533_v53 = vmax.f32 %v1961_v44, 0.0  ;;  %v1452_v54 = vadd.f32 %v4864_v49, %v5732_v52  ;;  %v1964_v55 = vadd.f32 %v4992_v50, %v5732_v52  ;;  %v1443_v56 = vpop.f32.mrb[23].mxu0  ;;  %v1955_v57 = vpop.f32.mrb[23].mxu1 }
 0x109   :  { %v2403_v58 = vmax.f32 %v1441_v47, 0.0  ;;  %v2531_v59 = vmax.f32 %v1953_v48, 0.0  ;;  %v1444_v60 = vadd.f32 %v5732_v52, %v1443_v56  ;;  %v1956_v61 = vadd.f32 %v5732_v52, %v1955_v57 }
 0x10a   :  { %v4473_v62 = vpack.c.bf16 %v2405_v51, %v2405_v51  ;;  %v4601_v63 = vpack.c.bf16 %v2533_v53, %v2533_v53  ;;  %v2406_v0 = vmax.f32 %v1452_v54, 0.0  ;;  %v2534_v1 = vmax.f32 %v1964_v55, 0.0 }
 0x10b   :  { %v4471_v2 = vpack.c.bf16 %v2403_v58, %v2403_v58  ;;  %v4599_v3 = vpack.c.bf16 %v2531_v59, %v2531_v59  ;;  %v2404_v4 = vmax.f32 %v1444_v60, 0.0  ;;  %v2532_v5 = vmax.f32 %v1956_v61, 0.0 }
 0x10c   :  { %3686 = vst.msk [vmem:[#allocation2 + $0x58] sm:$0xf] %vm3663_vm3, %v4473_v62  ;;  %3814 = vst.msk [vmem:[#allocation2 + $0x258] sm:$0xf] %vm3663_vm3, %v4601_v63  ;;  %v4474_v6 = vpack.c.bf16 %v2406_v0, %v2406_v0  ;;  %v4602_v7 = vpack.c.bf16 %v2534_v1, %v2534_v1 }
 0x10d   :  { %3684 = vst.msk [vmem:[#allocation2 + $0x50] sm:$0xf] %vm3663_vm3, %v4471_v2  ;;  %3812 = vst.msk [vmem:[#allocation2 + $0x250] sm:$0xf] %vm3663_vm3, %v4599_v3  ;;  %v4472_v8 = vpack.c.bf16 %v2404_v4, %v2404_v4  ;;  %v4600_v9 = vpack.c.bf16 %v2532_v5, %v2532_v5  ;;  %v4867_v10 = vpop.f32.mrb[24].mxu0  ;;  %v4995_v11 = vpop.f32.mrb[24].mxu1 }
 0x10e   :  { %3687 = vst.msk [vmem:[#allocation2 + $0x5c] sm:$0xf] %vm3663_vm3, %v4474_v6  ;;  %3815 = vst.msk [vmem:[#allocation2 + $0x25c] sm:$0xf] %vm3663_vm3, %v4602_v7  ;;  %v1465_v12 = vadd.f32 %v4867_v10, %v5732_v52  ;;  %v1977_v13 = vadd.f32 %v4995_v11, %v5732_v52  ;;  %v1456_v14 = vpop.f32.mrb[25].mxu0  ;;  %v1968_v15 = vpop.f32.mrb[25].mxu1 }
 0x10f   :  { %3685 = vst.msk [vmem:[#allocation2 + $0x54] sm:$0xf] %vm3663_vm3, %v4472_v8  ;;  %3813 = vst.msk [vmem:[#allocation2 + $0x254] sm:$0xf] %vm3663_vm3, %v4600_v9  ;;  %v1457_v16 = vadd.f32 %v5732_v52, %v1456_v14  ;;  %v1969_v17 = vadd.f32 %v5732_v52, %v1968_v15  ;;  %v4868_v18 = vpop.f32.mrb[26].mxu0  ;;  %v4996_v19 = vpop.f32.mrb[26].mxu1 }
 0x110   :  { %v2409_v20 = vmax.f32 %v1465_v12, 0.0  ;;  %v2537_v21 = vmax.f32 %v1977_v13, 0.0  ;;  %v1468_v22 = vadd.f32 %v4868_v18, %v5732_v52  ;;  %v1980_v23 = vadd.f32 %v4996_v19, %v5732_v52  ;;  %v1459_v24 = vpop.f32.mrb[27].mxu0  ;;  %v1971_v25 = vpop.f32.mrb[27].mxu1 }
 0x111   :  { %v2407_v26 = vmax.f32 %v1457_v16, 0.0  ;;  %v2535_v27 = vmax.f32 %v1969_v17, 0.0  ;;  %v1460_v28 = vadd.f32 %v5732_v52, %v1459_v24  ;;  %v1972_v29 = vadd.f32 %v5732_v52, %v1971_v25 }
 0x112   :  { %v4477_v30 = vpack.c.bf16 %v2409_v20, %v2409_v20  ;;  %v4605_v31 = vpack.c.bf16 %v2537_v21, %v2537_v21  ;;  %v2410_v32 = vmax.f32 %v1468_v22, 0.0  ;;  %v2538_v33 = vmax.f32 %v1980_v23, 0.0 }
 0x113   :  { %v4475_v34 = vpack.c.bf16 %v2407_v26, %v2407_v26  ;;  %v4603_v35 = vpack.c.bf16 %v2535_v27, %v2535_v27  ;;  %v2408_v36 = vmax.f32 %v1460_v28, 0.0  ;;  %v2536_v37 = vmax.f32 %v1972_v29, 0.0 }
 0x114   :  { %3690 = vst.msk [vmem:[#allocation2 + $0x68] sm:$0xf] %vm3663_vm3, %v4477_v30  ;;  %3818 = vst.msk [vmem:[#allocation2 + $0x268] sm:$0xf] %vm3663_vm3, %v4605_v31  ;;  %v4478_v38 = vpack.c.bf16 %v2410_v32, %v2410_v32  ;;  %v4606_v39 = vpack.c.bf16 %v2538_v33, %v2538_v33 }
 0x115   :  { %3688 = vst.msk [vmem:[#allocation2 + $0x60] sm:$0xf] %vm3663_vm3, %v4475_v34  ;;  %3816 = vst.msk [vmem:[#allocation2 + $0x260] sm:$0xf] %vm3663_vm3, %v4603_v35  ;;  %v4476_v40 = vpack.c.bf16 %v2408_v36, %v2408_v36  ;;  %v4604_v41 = vpack.c.bf16 %v2536_v37, %v2536_v37  ;;  %v4871_v42 = vpop.f32.mrb[28].mxu0  ;;  %v4999_v43 = vpop.f32.mrb[28].mxu1 }
 0x116   :  { %3691 = vst.msk [vmem:[#allocation2 + $0x6c] sm:$0xf] %vm3663_vm3, %v4478_v38  ;;  %3819 = vst.msk [vmem:[#allocation2 + $0x26c] sm:$0xf] %vm3663_vm3, %v4606_v39  ;;  %v1481_v44 = vadd.f32 %v4871_v42, %v5732_v52  ;;  %v1993_v45 = vadd.f32 %v4999_v43, %v5732_v52  ;;  %v1472_v46 = vpop.f32.mrb[29].mxu0  ;;  %v1984_v47 = vpop.f32.mrb[29].mxu1 }
 0x117   :  { %3689 = vst.msk [vmem:[#allocation2 + $0x64] sm:$0xf] %vm3663_vm3, %v4476_v40  ;;  %3817 = vst.msk [vmem:[#allocation2 + $0x264] sm:$0xf] %vm3663_vm3, %v4604_v41  ;;  %v1473_v48 = vadd.f32 %v5732_v52, %v1472_v46  ;;  %v1985_v49 = vadd.f32 %v5732_v52, %v1984_v47  ;;  %v4872_v50 = vpop.f32.mrb[30].mxu0  ;;  %v5000_v51 = vpop.f32.mrb[30].mxu1 }
 0x118   :  { %v2413_v53 = vmax.f32 %v1481_v44, 0.0  ;;  %v2541_v54 = vmax.f32 %v1993_v45, 0.0  ;;  %v1484_v55 = vadd.f32 %v4872_v50, %v5732_v52  ;;  %v1996_v56 = vadd.f32 %v5000_v51, %v5732_v52  ;;  %v1475_v57 = vpop.f32.mrb[31].mxu0  ;;  %v1987_v58 = vpop.f32.mrb[31].mxu1 }
 0x119   :  { %v2411_v59 = vmax.f32 %v1473_v48, 0.0  ;;  %v2539_v60 = vmax.f32 %v1985_v49, 0.0  ;;  %v1476_v61 = vadd.f32 %v5732_v52, %v1475_v57  ;;  %v1988_v62 = vadd.f32 %v5732_v52, %v1987_v58 }
 0x11a   :  { %v4481_v63 = vpack.c.bf16 %v2413_v53, %v2413_v53  ;;  %v4609_v0 = vpack.c.bf16 %v2541_v54, %v2541_v54  ;;  %v2414_v1 = vmax.f32 %v1484_v55, 0.0  ;;  %v2542_v2 = vmax.f32 %v1996_v56, 0.0 }
 0x11b   :  { %v4479_v3 = vpack.c.bf16 %v2411_v59, %v2411_v59  ;;  %v4607_v4 = vpack.c.bf16 %v2539_v60, %v2539_v60  ;;  %v2412_v5 = vmax.f32 %v1476_v61, 0.0  ;;  %v2540_v6 = vmax.f32 %v1988_v62, 0.0 }
 0x11c   :  { %3694 = vst.msk [vmem:[#allocation2 + $0x78] sm:$0xf] %vm3663_vm3, %v4481_v63  ;;  %3822 = vst.msk [vmem:[#allocation2 + $0x278] sm:$0xf] %vm3663_vm3, %v4609_v0  ;;  %v4482_v7 = vpack.c.bf16 %v2414_v1, %v2414_v1  ;;  %v4610_v8 = vpack.c.bf16 %v2542_v2, %v2542_v2 }
 0x11d   :  { %3692 = vst.msk [vmem:[#allocation2 + $0x70] sm:$0xf] %vm3663_vm3, %v4479_v3  ;;  %3820 = vst.msk [vmem:[#allocation2 + $0x270] sm:$0xf] %vm3663_vm3, %v4607_v4  ;;  %v4480_v9 = vpack.c.bf16 %v2412_v5, %v2412_v5  ;;  %v4608_v10 = vpack.c.bf16 %v2540_v6, %v2540_v6  ;;  %v4875_v11 = vpop.f32.mrb[32].mxu0  ;;  %v5003_v12 = vpop.f32.mrb[32].mxu1 }
 0x11e   :  { %3695 = vst.msk [vmem:[#allocation2 + $0x7c] sm:$0xf] %vm3663_vm3, %v4482_v7  ;;  %3823 = vst.msk [vmem:[#allocation2 + $0x27c] sm:$0xf] %vm3663_vm3, %v4610_v8  ;;  %v1497_v13 = vadd.f32 %v4875_v11, %v5732_v52  ;;  %v2009_v14 = vadd.f32 %v5003_v12, %v5732_v52  ;;  %v1488_v15 = vpop.f32.mrb[33].mxu0  ;;  %v2000_v16 = vpop.f32.mrb[33].mxu1 }
 0x11f   :  { %3693 = vst.msk [vmem:[#allocation2 + $0x74] sm:$0xf] %vm3663_vm3, %v4480_v9  ;;  %3821 = vst.msk [vmem:[#allocation2 + $0x274] sm:$0xf] %vm3663_vm3, %v4608_v10  ;;  %v1489_v17 = vadd.f32 %v5732_v52, %v1488_v15  ;;  %v2001_v18 = vadd.f32 %v5732_v52, %v2000_v16  ;;  %v4876_v19 = vpop.f32.mrb[34].mxu0  ;;  %v5004_v20 = vpop.f32.mrb[34].mxu1 }
 0x120   :  { %v2417_v21 = vmax.f32 %v1497_v13, 0.0  ;;  %v2545_v22 = vmax.f32 %v2009_v14, 0.0  ;;  %v1500_v23 = vadd.f32 %v4876_v19, %v5732_v52  ;;  %v2012_v24 = vadd.f32 %v5004_v20, %v5732_v52  ;;  %v1491_v25 = vpop.f32.mrb[35].mxu0  ;;  %v2003_v26 = vpop.f32.mrb[35].mxu1 }
 0x121   :  { %v2415_v27 = vmax.f32 %v1489_v17, 0.0  ;;  %v2543_v28 = vmax.f32 %v2001_v18, 0.0  ;;  %v1492_v29 = vadd.f32 %v5732_v52, %v1491_v25  ;;  %v2004_v30 = vadd.f32 %v5732_v52, %v2003_v26 }
 0x122   :  { %v4485_v31 = vpack.c.bf16 %v2417_v21, %v2417_v21  ;;  %v4613_v32 = vpack.c.bf16 %v2545_v22, %v2545_v22  ;;  %v2418_v33 = vmax.f32 %v1500_v23, 0.0  ;;  %v2546_v34 = vmax.f32 %v2012_v24, 0.0 }
 0x123   :  { %v4483_v35 = vpack.c.bf16 %v2415_v27, %v2415_v27  ;;  %v4611_v36 = vpack.c.bf16 %v2543_v28, %v2543_v28  ;;  %v2416_v37 = vmax.f32 %v1492_v29, 0.0  ;;  %v2544_v38 = vmax.f32 %v2004_v30, 0.0 }
 0x124   :  { %3698 = vst.msk [vmem:[#allocation2 + $0x88] sm:$0xf] %vm3663_vm3, %v4485_v31  ;;  %3826 = vst.msk [vmem:[#allocation2 + $0x288] sm:$0xf] %vm3663_vm3, %v4613_v32  ;;  %v4486_v39 = vpack.c.bf16 %v2418_v33, %v2418_v33  ;;  %v4614_v40 = vpack.c.bf16 %v2546_v34, %v2546_v34 }
 0x125   :  { %3696 = vst.msk [vmem:[#allocation2 + $0x80] sm:$0xf] %vm3663_vm3, %v4483_v35  ;;  %3824 = vst.msk [vmem:[#allocation2 + $0x280] sm:$0xf] %vm3663_vm3, %v4611_v36  ;;  %v4484_v41 = vpack.c.bf16 %v2416_v37, %v2416_v37  ;;  %v4612_v42 = vpack.c.bf16 %v2544_v38, %v2544_v38  ;;  %v4879_v43 = vpop.f32.mrb[36].mxu0  ;;  %v5007_v44 = vpop.f32.mrb[36].mxu1 }
 0x126   :  { %3699 = vst.msk [vmem:[#allocation2 + $0x8c] sm:$0xf] %vm3663_vm3, %v4486_v39  ;;  %3827 = vst.msk [vmem:[#allocation2 + $0x28c] sm:$0xf] %vm3663_vm3, %v4614_v40  ;;  %v1513_v45 = vadd.f32 %v4879_v43, %v5732_v52  ;;  %v2025_v46 = vadd.f32 %v5007_v44, %v5732_v52  ;;  %v1504_v47 = vpop.f32.mrb[37].mxu0  ;;  %v2016_v48 = vpop.f32.mrb[37].mxu1 }
 0x127   :  { %3697 = vst.msk [vmem:[#allocation2 + $0x84] sm:$0xf] %vm3663_vm3, %v4484_v41  ;;  %3825 = vst.msk [vmem:[#allocation2 + $0x284] sm:$0xf] %vm3663_vm3, %v4612_v42  ;;  %v1505_v49 = vadd.f32 %v5732_v52, %v1504_v47  ;;  %v2017_v50 = vadd.f32 %v5732_v52, %v2016_v48  ;;  %v4880_v51 = vpop.f32.mrb[38].mxu0  ;;  %v5008_v53 = vpop.f32.mrb[38].mxu1 }
 0x128   :  { %v2421_v54 = vmax.f32 %v1513_v45, 0.0  ;;  %v2549_v55 = vmax.f32 %v2025_v46, 0.0  ;;  %v1516_v56 = vadd.f32 %v4880_v51, %v5732_v52  ;;  %v2028_v57 = vadd.f32 %v5008_v53, %v5732_v52  ;;  %v1507_v58 = vpop.f32.mrb[39].mxu0  ;;  %v2019_v59 = vpop.f32.mrb[39].mxu1 }
 0x129   :  { %v2419_v60 = vmax.f32 %v1505_v49, 0.0  ;;  %v2547_v61 = vmax.f32 %v2017_v50, 0.0  ;;  %v1508_v62 = vadd.f32 %v5732_v52, %v1507_v58  ;;  %v2020_v63 = vadd.f32 %v5732_v52, %v2019_v59 }
 0x12a   :  { %v4489_v0 = vpack.c.bf16 %v2421_v54, %v2421_v54  ;;  %v4617_v1 = vpack.c.bf16 %v2549_v55, %v2549_v55  ;;  %v2422_v2 = vmax.f32 %v1516_v56, 0.0  ;;  %v2550_v3 = vmax.f32 %v2028_v57, 0.0 }
 0x12b   :  { %v4487_v4 = vpack.c.bf16 %v2419_v60, %v2419_v60  ;;  %v4615_v5 = vpack.c.bf16 %v2547_v61, %v2547_v61  ;;  %v2420_v6 = vmax.f32 %v1508_v62, 0.0  ;;  %v2548_v7 = vmax.f32 %v2020_v63, 0.0 }
 0x12c   :  { %3702 = vst.msk [vmem:[#allocation2 + $0x98] sm:$0xf] %vm3663_vm3, %v4489_v0  ;;  %3830 = vst.msk [vmem:[#allocation2 + $0x298] sm:$0xf] %vm3663_vm3, %v4617_v1  ;;  %v4490_v8 = vpack.c.bf16 %v2422_v2, %v2422_v2  ;;  %v4618_v9 = vpack.c.bf16 %v2550_v3, %v2550_v3 }
 0x12d   :  { %3700 = vst.msk [vmem:[#allocation2 + $0x90] sm:$0xf] %vm3663_vm3, %v4487_v4  ;;  %3828 = vst.msk [vmem:[#allocation2 + $0x290] sm:$0xf] %vm3663_vm3, %v4615_v5  ;;  %v4488_v10 = vpack.c.bf16 %v2420_v6, %v2420_v6  ;;  %v4616_v11 = vpack.c.bf16 %v2548_v7, %v2548_v7  ;;  %v4883_v12 = vpop.f32.mrb[40].mxu0  ;;  %v5011_v13 = vpop.f32.mrb[40].mxu1 }
 0x12e   :  { %3703 = vst.msk [vmem:[#allocation2 + $0x9c] sm:$0xf] %vm3663_vm3, %v4490_v8  ;;  %3831 = vst.msk [vmem:[#allocation2 + $0x29c] sm:$0xf] %vm3663_vm3, %v4618_v9  ;;  %v1529_v14 = vadd.f32 %v4883_v12, %v5732_v52  ;;  %v2041_v15 = vadd.f32 %v5011_v13, %v5732_v52  ;;  %v1520_v16 = vpop.f32.mrb[41].mxu0  ;;  %v2032_v17 = vpop.f32.mrb[41].mxu1 }
 0x12f   :  { %3701 = vst.msk [vmem:[#allocation2 + $0x94] sm:$0xf] %vm3663_vm3, %v4488_v10  ;;  %3829 = vst.msk [vmem:[#allocation2 + $0x294] sm:$0xf] %vm3663_vm3, %v4616_v11  ;;  %v1521_v18 = vadd.f32 %v5732_v52, %v1520_v16  ;;  %v2033_v19 = vadd.f32 %v5732_v52, %v2032_v17  ;;  %v4884_v20 = vpop.f32.mrb[42].mxu0  ;;  %v5012_v21 = vpop.f32.mrb[42].mxu1 }
 0x130   :  { %v2425_v22 = vmax.f32 %v1529_v14, 0.0  ;;  %v2553_v23 = vmax.f32 %v2041_v15, 0.0  ;;  %v1532_v24 = vadd.f32 %v4884_v20, %v5732_v52  ;;  %v2044_v25 = vadd.f32 %v5012_v21, %v5732_v52  ;;  %v1523_v26 = vpop.f32.mrb[43].mxu0  ;;  %v2035_v27 = vpop.f32.mrb[43].mxu1  ;;  %v6001_v14 = vld [vmem:[%s6344_s2] ss:$0 sm:$0xff] }
 0x131   :  { %v2423_v28 = vmax.f32 %v1521_v18, 0.0  ;;  %v2551_v29 = vmax.f32 %v2033_v19, 0.0  ;;  %v1524_v30 = vadd.f32 %v5732_v52, %v1523_v26  ;;  %v2036_v31 = vadd.f32 %v5732_v52, %v2035_v27 }
 0x132   :  { %v4493_v32 = vpack.c.bf16 %v2425_v22, %v2425_v22  ;;  %v4621_v33 = vpack.c.bf16 %v2553_v23, %v2553_v23  ;;  %v2426_v34 = vmax.f32 %v1532_v24, 0.0  ;;  %v2554_v35 = vmax.f32 %v2044_v25, 0.0 }
 0x133   :  { %v4491_v36 = vpack.c.bf16 %v2423_v28, %v2423_v28  ;;  %v4619_v37 = vpack.c.bf16 %v2551_v29, %v2551_v29  ;;  %v2424_v38 = vmax.f32 %v1524_v30, 0.0  ;;  %v2552_v39 = vmax.f32 %v2036_v31, 0.0 }
 0x134   :  { %3706 = vst.msk [vmem:[#allocation2 + $0xa8] sm:$0xf] %vm3663_vm3, %v4493_v32  ;;  %3834 = vst.msk [vmem:[#allocation2 + $0x2a8] sm:$0xf] %vm3663_vm3, %v4621_v33  ;;  %v4494_v40 = vpack.c.bf16 %v2426_v34, %v2426_v34  ;;  %v4622_v41 = vpack.c.bf16 %v2554_v35, %v2554_v35 }
 0x135   :  { %3704 = vst.msk [vmem:[#allocation2 + $0xa0] sm:$0xf] %vm3663_vm3, %v4491_v36  ;;  %3832 = vst.msk [vmem:[#allocation2 + $0x2a0] sm:$0xf] %vm3663_vm3, %v4619_v37  ;;  %v4492_v42 = vpack.c.bf16 %v2424_v38, %v2424_v38  ;;  %v4620_v43 = vpack.c.bf16 %v2552_v39, %v2552_v39  ;;  %v4887_v44 = vpop.f32.mrb[44].mxu0  ;;  %v5015_v45 = vpop.f32.mrb[44].mxu1 }
 0x136   :  { %3707 = vst.msk [vmem:[#allocation2 + $0xac] sm:$0xf] %vm3663_vm3, %v4494_v40  ;;  %3835 = vst.msk [vmem:[#allocation2 + $0x2ac] sm:$0xf] %vm3663_vm3, %v4622_v41  ;;  %v1545_v46 = vadd.f32 %v4887_v44, %v5732_v52  ;;  %v2057_v47 = vadd.f32 %v5015_v45, %v5732_v52  ;;  %v1536_v48 = vpop.f32.mrb[45].mxu0  ;;  %v2048_v49 = vpop.f32.mrb[45].mxu1 }
 0x137   :  { %3705 = vst.msk [vmem:[#allocation2 + $0xa4] sm:$0xf] %vm3663_vm3, %v4492_v42  ;;  %3833 = vst.msk [vmem:[#allocation2 + $0x2a4] sm:$0xf] %vm3663_vm3, %v4620_v43  ;;  %v1537_v50 = vadd.f32 %v5732_v52, %v1536_v48  ;;  %v2049_v51 = vadd.f32 %v5732_v52, %v2048_v49  ;;  %v4888_v53 = vpop.f32.mrb[46].mxu0  ;;  %v5016_v54 = vpop.f32.mrb[46].mxu1 }
 0x138   :  { %v2429_v55 = vmax.f32 %v1545_v46, 0.0  ;;  %v2557_v56 = vmax.f32 %v2057_v47, 0.0  ;;  %v1548_v57 = vadd.f32 %v4888_v53, %v5732_v52  ;;  %v2060_v58 = vadd.f32 %v5016_v54, %v5732_v52  ;;  %v1539_v59 = vpop.f32.mrb[47].mxu0  ;;  %v2051_v60 = vpop.f32.mrb[47].mxu1 }
 0x139   :  { %v2427_v61 = vmax.f32 %v1537_v50, 0.0  ;;  %v2555_v62 = vmax.f32 %v2049_v51, 0.0  ;;  %v1540_v63 = vadd.f32 %v5732_v52, %v1539_v59  ;;  %v2052_v0 = vadd.f32 %v5732_v52, %v2051_v60 }
 0x13a   :  { %v4497_v1 = vpack.c.bf16 %v2429_v55, %v2429_v55  ;;  %v4625_v2 = vpack.c.bf16 %v2557_v56, %v2557_v56  ;;  %v2430_v3 = vmax.f32 %v1548_v57, 0.0  ;;  %v2558_v4 = vmax.f32 %v2060_v58, 0.0 }
 0x13b   :  { %v4495_v5 = vpack.c.bf16 %v2427_v61, %v2427_v61  ;;  %v4623_v6 = vpack.c.bf16 %v2555_v62, %v2555_v62  ;;  %v2428_v7 = vmax.f32 %v1540_v63, 0.0  ;;  %v2556_v8 = vmax.f32 %v2052_v0, 0.0 }
 0x13c   :  { %3710 = vst.msk [vmem:[#allocation2 + $0xb8] sm:$0xf] %vm3663_vm3, %v4497_v1  ;;  %3838 = vst.msk [vmem:[#allocation2 + $0x2b8] sm:$0xf] %vm3663_vm3, %v4625_v2  ;;  %v4498_v9 = vpack.c.bf16 %v2430_v3, %v2430_v3  ;;  %v4626_v10 = vpack.c.bf16 %v2558_v4, %v2558_v4 }
 0x13d   :  { %3708 = vst.msk [vmem:[#allocation2 + $0xb0] sm:$0xf] %vm3663_vm3, %v4495_v5  ;;  %3836 = vst.msk [vmem:[#allocation2 + $0x2b0] sm:$0xf] %vm3663_vm3, %v4623_v6  ;;  %v4496_v11 = vpack.c.bf16 %v2428_v7, %v2428_v7  ;;  %v4624_v52 = vpack.c.bf16 %v2556_v8, %v2556_v8  ;;  %v4891_v12 = vpop.f32.mrb[48].mxu0  ;;  %v5019_v13 = vpop.f32.mrb[48].mxu1 }
 0x13e   :  { %3711 = vst.msk [vmem:[#allocation2 + $0xbc] sm:$0xf] %vm3663_vm3, %v4498_v9  ;;  %3839 = vst.msk [vmem:[#allocation2 + $0x2bc] sm:$0xf] %vm3663_vm3, %v4626_v10  ;;  %v1561_v15 = vadd.f32 %v6001_v14, %v4891_v12  ;;  %v2073_v16 = vadd.f32 %v6001_v14, %v5019_v13  ;;  %v1552_v17 = vpop.f32.mrb[49].mxu0  ;;  %v2064_v18 = vpop.f32.mrb[49].mxu1 }
 0x13f   :  { %3709 = vst.msk [vmem:[#allocation2 + $0xb4] sm:$0xf] %vm3663_vm3, %v4496_v11  ;;  %3837 = vst.msk [vmem:[#allocation2 + $0x2b4] sm:$0xf] %vm3663_vm3, %v4624_v52  ;;  %v1553_v19 = vadd.f32 %v6001_v14, %v1552_v17  ;;  %v2065_v20 = vadd.f32 %v6001_v14, %v2064_v18  ;;  %v4892_v21 = vpop.f32.mrb[50].mxu0  ;;  %v5020_v22 = vpop.f32.mrb[50].mxu1 }
 0x140   :  { %v2433_v23 = vmax.f32 %v1561_v15, 0.0  ;;  %v2561_v24 = vmax.f32 %v2073_v16, 0.0  ;;  %v1564_v25 = vadd.f32 %v6001_v14, %v4892_v21  ;;  %v2076_v26 = vadd.f32 %v6001_v14, %v5020_v22  ;;  %v1555_v27 = vpop.f32.mrb[51].mxu0  ;;  %v2067_v28 = vpop.f32.mrb[51].mxu1 }
 0x141   :  { %v2431_v29 = vmax.f32 %v1553_v19, 0.0  ;;  %v2559_v30 = vmax.f32 %v2065_v20, 0.0  ;;  %v1556_v31 = vadd.f32 %v6001_v14, %v1555_v27  ;;  %v2068_v32 = vadd.f32 %v6001_v14, %v2067_v28 }
 0x142   :  { %v4501_v33 = vpack.c.bf16 %v2433_v23, %v2433_v23  ;;  %v4629_v34 = vpack.c.bf16 %v2561_v24, %v2561_v24  ;;  %v2434_v35 = vmax.f32 %v1564_v25, 0.0  ;;  %v2562_v36 = vmax.f32 %v2076_v26, 0.0 }
 0x143   :  { %v4499_v37 = vpack.c.bf16 %v2431_v29, %v2431_v29  ;;  %v4627_v38 = vpack.c.bf16 %v2559_v30, %v2559_v30  ;;  %v2432_v39 = vmax.f32 %v1556_v31, 0.0  ;;  %v2560_v40 = vmax.f32 %v2068_v32, 0.0 }
 0x144   :  { %3714 = vst.msk [vmem:[#allocation2 + $0xc8] sm:$0xf] %vm3663_vm3, %v4501_v33  ;;  %3842 = vst.msk [vmem:[#allocation2 + $0x2c8] sm:$0xf] %vm3663_vm3, %v4629_v34  ;;  %v4502_v41 = vpack.c.bf16 %v2434_v35, %v2434_v35  ;;  %v4630_v42 = vpack.c.bf16 %v2562_v36, %v2562_v36 }
 0x145   :  { %3712 = vst.msk [vmem:[#allocation2 + $0xc0] sm:$0xf] %vm3663_vm3, %v4499_v37  ;;  %3840 = vst.msk [vmem:[#allocation2 + $0x2c0] sm:$0xf] %vm3663_vm3, %v4627_v38  ;;  %v4500_v43 = vpack.c.bf16 %v2432_v39, %v2432_v39  ;;  %v4628_v44 = vpack.c.bf16 %v2560_v40, %v2560_v40  ;;  %v4895_v45 = vpop.f32.mrb[52].mxu0  ;;  %v5023_v46 = vpop.f32.mrb[52].mxu1 }
 0x146   :  { %3715 = vst.msk [vmem:[#allocation2 + $0xcc] sm:$0xf] %vm3663_vm3, %v4502_v41  ;;  %3843 = vst.msk [vmem:[#allocation2 + $0x2cc] sm:$0xf] %vm3663_vm3, %v4630_v42  ;;  %v1577_v47 = vadd.f32 %v6001_v14, %v4895_v45  ;;  %v2089_v48 = vadd.f32 %v6001_v14, %v5023_v46  ;;  %v1568_v49 = vpop.f32.mrb[53].mxu0  ;;  %v2080_v50 = vpop.f32.mrb[53].mxu1 }
 0x147   :  { %3713 = vst.msk [vmem:[#allocation2 + $0xc4] sm:$0xf] %vm3663_vm3, %v4500_v43  ;;  %3841 = vst.msk [vmem:[#allocation2 + $0x2c4] sm:$0xf] %vm3663_vm3, %v4628_v44  ;;  %v1569_v51 = vadd.f32 %v6001_v14, %v1568_v49  ;;  %v2081_v53 = vadd.f32 %v6001_v14, %v2080_v50  ;;  %v4896_v54 = vpop.f32.mrb[54].mxu0  ;;  %v5024_v55 = vpop.f32.mrb[54].mxu1 }
 0x148   :  { %v2437_v56 = vmax.f32 %v1577_v47, 0.0  ;;  %v2565_v57 = vmax.f32 %v2089_v48, 0.0  ;;  %v1580_v58 = vadd.f32 %v6001_v14, %v4896_v54  ;;  %v2092_v59 = vadd.f32 %v6001_v14, %v5024_v55  ;;  %v1571_v60 = vpop.f32.mrb[55].mxu0  ;;  %v2083_v61 = vpop.f32.mrb[55].mxu1 }
 0x149   :  { %v2435_v62 = vmax.f32 %v1569_v51, 0.0  ;;  %v2563_v63 = vmax.f32 %v2081_v53, 0.0  ;;  %v1572_v0 = vadd.f32 %v6001_v14, %v1571_v60  ;;  %v2084_v1 = vadd.f32 %v6001_v14, %v2083_v61 }
 0x14a   :  { %v4505_v2 = vpack.c.bf16 %v2437_v56, %v2437_v56  ;;  %v4633_v3 = vpack.c.bf16 %v2565_v57, %v2565_v57  ;;  %v2438_v4 = vmax.f32 %v1580_v58, 0.0  ;;  %v2566_v5 = vmax.f32 %v2092_v59, 0.0 }
 0x14b   :  { %v4503_v6 = vpack.c.bf16 %v2435_v62, %v2435_v62  ;;  %v4631_v7 = vpack.c.bf16 %v2563_v63, %v2563_v63  ;;  %v2436_v8 = vmax.f32 %v1572_v0, 0.0  ;;  %v2564_v9 = vmax.f32 %v2084_v1, 0.0 }
 0x14c   :  { %3718 = vst.msk [vmem:[#allocation2 + $0xd8] sm:$0xf] %vm3663_vm3, %v4505_v2  ;;  %3846 = vst.msk [vmem:[#allocation2 + $0x2d8] sm:$0xf] %vm3663_vm3, %v4633_v3  ;;  %v4506_v10 = vpack.c.bf16 %v2438_v4, %v2438_v4  ;;  %v4634_v11 = vpack.c.bf16 %v2566_v5, %v2566_v5 }
 0x14d   :  { %3716 = vst.msk [vmem:[#allocation2 + $0xd0] sm:$0xf] %vm3663_vm3, %v4503_v6  ;;  %3844 = vst.msk [vmem:[#allocation2 + $0x2d0] sm:$0xf] %vm3663_vm3, %v4631_v7  ;;  %v4504_v52 = vpack.c.bf16 %v2436_v8, %v2436_v8  ;;  %v4632_v12 = vpack.c.bf16 %v2564_v9, %v2564_v9  ;;  %v4899_v13 = vpop.f32.mrb[56].mxu0  ;;  %v5027_v15 = vpop.f32.mrb[56].mxu1 }
 0x14e   :  { %3719 = vst.msk [vmem:[#allocation2 + $0xdc] sm:$0xf] %vm3663_vm3, %v4506_v10  ;;  %3847 = vst.msk [vmem:[#allocation2 + $0x2dc] sm:$0xf] %vm3663_vm3, %v4634_v11  ;;  %v1593_v16 = vadd.f32 %v6001_v14, %v4899_v13  ;;  %v2105_v17 = vadd.f32 %v6001_v14, %v5027_v15  ;;  %v1584_v18 = vpop.f32.mrb[57].mxu0  ;;  %v2096_v19 = vpop.f32.mrb[57].mxu1 }
 0x14f   :  { %3717 = vst.msk [vmem:[#allocation2 + $0xd4] sm:$0xf] %vm3663_vm3, %v4504_v52  ;;  %3845 = vst.msk [vmem:[#allocation2 + $0x2d4] sm:$0xf] %vm3663_vm3, %v4632_v12  ;;  %v1585_v20 = vadd.f32 %v6001_v14, %v1584_v18  ;;  %v2097_v21 = vadd.f32 %v6001_v14, %v2096_v19  ;;  %v4900_v22 = vpop.f32.mrb[58].mxu0  ;;  %v5028_v23 = vpop.f32.mrb[58].mxu1 }
 0x150   :  { %v2441_v24 = vmax.f32 %v1593_v16, 0.0  ;;  %v2569_v25 = vmax.f32 %v2105_v17, 0.0  ;;  %v1596_v26 = vadd.f32 %v6001_v14, %v4900_v22  ;;  %v2108_v27 = vadd.f32 %v6001_v14, %v5028_v23  ;;  %v1587_v28 = vpop.f32.mrb[59].mxu0  ;;  %v2099_v29 = vpop.f32.mrb[59].mxu1 }
 0x151   :  { %v2439_v30 = vmax.f32 %v1585_v20, 0.0  ;;  %v2567_v31 = vmax.f32 %v2097_v21, 0.0  ;;  %v1588_v32 = vadd.f32 %v6001_v14, %v1587_v28  ;;  %v2100_v33 = vadd.f32 %v6001_v14, %v2099_v29 }
 0x152   :  { %v4509_v34 = vpack.c.bf16 %v2441_v24, %v2441_v24  ;;  %v4637_v35 = vpack.c.bf16 %v2569_v25, %v2569_v25  ;;  %v2442_v36 = vmax.f32 %v1596_v26, 0.0  ;;  %v2570_v37 = vmax.f32 %v2108_v27, 0.0 }
 0x153   :  { %v4507_v38 = vpack.c.bf16 %v2439_v30, %v2439_v30  ;;  %v4635_v39 = vpack.c.bf16 %v2567_v31, %v2567_v31  ;;  %v2440_v40 = vmax.f32 %v1588_v32, 0.0  ;;  %v2568_v41 = vmax.f32 %v2100_v33, 0.0 }
 0x154   :  { %3722 = vst.msk [vmem:[#allocation2 + $0xe8] sm:$0xf] %vm3663_vm3, %v4509_v34  ;;  %3850 = vst.msk [vmem:[#allocation2 + $0x2e8] sm:$0xf] %vm3663_vm3, %v4637_v35  ;;  %v4510_v42 = vpack.c.bf16 %v2442_v36, %v2442_v36  ;;  %v4638_v43 = vpack.c.bf16 %v2570_v37, %v2570_v37 }
 0x155   :  { %3720 = vst.msk [vmem:[#allocation2 + $0xe0] sm:$0xf] %vm3663_vm3, %v4507_v38  ;;  %3848 = vst.msk [vmem:[#allocation2 + $0x2e0] sm:$0xf] %vm3663_vm3, %v4635_v39  ;;  %v4508_v44 = vpack.c.bf16 %v2440_v40, %v2440_v40  ;;  %v4636_v45 = vpack.c.bf16 %v2568_v41, %v2568_v41  ;;  %v4903_v46 = vpop.f32.mrb[60].mxu0  ;;  %v5031_v47 = vpop.f32.mrb[60].mxu1 }
 0x156   :  { %3723 = vst.msk [vmem:[#allocation2 + $0xec] sm:$0xf] %vm3663_vm3, %v4510_v42  ;;  %3851 = vst.msk [vmem:[#allocation2 + $0x2ec] sm:$0xf] %vm3663_vm3, %v4638_v43  ;;  %v1609_v48 = vadd.f32 %v6001_v14, %v4903_v46  ;;  %v2121_v49 = vadd.f32 %v6001_v14, %v5031_v47  ;;  %v1600_v50 = vpop.f32.mrb[61].mxu0  ;;  %v2112_v51 = vpop.f32.mrb[61].mxu1 }
 0x157   :  { %3721 = vst.msk [vmem:[#allocation2 + $0xe4] sm:$0xf] %vm3663_vm3, %v4508_v44  ;;  %3849 = vst.msk [vmem:[#allocation2 + $0x2e4] sm:$0xf] %vm3663_vm3, %v4636_v45  ;;  %v1601_v53 = vadd.f32 %v6001_v14, %v1600_v50  ;;  %v2113_v54 = vadd.f32 %v6001_v14, %v2112_v51  ;;  %v4904_v55 = vpop.f32.mrb[62].mxu0  ;;  %v5032_v56 = vpop.f32.mrb[62].mxu1 }
 0x158   :  { %v2445_v57 = vmax.f32 %v1609_v48, 0.0  ;;  %v2573_v58 = vmax.f32 %v2121_v49, 0.0  ;;  %v1612_v59 = vadd.f32 %v6001_v14, %v4904_v55  ;;  %v2124_v60 = vadd.f32 %v6001_v14, %v5032_v56  ;;  %v1603_v61 = vpop.f32.mrb[63].mxu0  ;;  %v2115_v62 = vpop.f32.mrb[63].mxu1 }
 0x159   :  { %v2443_v63 = vmax.f32 %v1601_v53, 0.0  ;;  %v2571_v0 = vmax.f32 %v2113_v54, 0.0  ;;  %v1604_v1 = vadd.f32 %v6001_v14, %v1603_v61  ;;  %v2116_v2 = vadd.f32 %v6001_v14, %v2115_v62 }
 0x15a   :  { %v4513_v3 = vpack.c.bf16 %v2445_v57, %v2445_v57  ;;  %v4641_v4 = vpack.c.bf16 %v2573_v58, %v2573_v58  ;;  %v2446_v5 = vmax.f32 %v1612_v59, 0.0  ;;  %v2574_v6 = vmax.f32 %v2124_v60, 0.0 }
 0x15b   :  { %v4511_v7 = vpack.c.bf16 %v2443_v63, %v2443_v63  ;;  %v4639_v8 = vpack.c.bf16 %v2571_v0, %v2571_v0  ;;  %v2444_v9 = vmax.f32 %v1604_v1, 0.0  ;;  %v2572_v10 = vmax.f32 %v2116_v2, 0.0 }
 0x15c   :  { %3726 = vst.msk [vmem:[#allocation2 + $0xf8] sm:$0xf] %vm3663_vm3, %v4513_v3  ;;  %3854 = vst.msk [vmem:[#allocation2 + $0x2f8] sm:$0xf] %vm3663_vm3, %v4641_v4  ;;  %v4514_v11 = vpack.c.bf16 %v2446_v5, %v2446_v5  ;;  %v4642_v52 = vpack.c.bf16 %v2574_v6, %v2574_v6 }
 0x15d   :  { %3724 = vst.msk [vmem:[#allocation2 + $0xf0] sm:$0xf] %vm3663_vm3, %v4511_v7  ;;  %3852 = vst.msk [vmem:[#allocation2 + $0x2f0] sm:$0xf] %vm3663_vm3, %v4639_v8  ;;  %v4512_v12 = vpack.c.bf16 %v2444_v9, %v2444_v9  ;;  %v4640_v13 = vpack.c.bf16 %v2572_v10, %v2572_v10  ;;  %v4907_v15 = vpop.f32.mrb[64].mxu0  ;;  %v5035_v16 = vpop.f32.mrb[64].mxu1 }
 0x15e   :  { %3727 = vst.msk [vmem:[#allocation2 + $0xfc] sm:$0xf] %vm3663_vm3, %v4514_v11  ;;  %3855 = vst.msk [vmem:[#allocation2 + $0x2fc] sm:$0xf] %vm3663_vm3, %v4642_v52  ;;  %v1625_v17 = vadd.f32 %v6001_v14, %v4907_v15  ;;  %v2137_v18 = vadd.f32 %v6001_v14, %v5035_v16  ;;  %v1616_v19 = vpop.f32.mrb[65].mxu0  ;;  %v2128_v20 = vpop.f32.mrb[65].mxu1 }
 0x15f   :  { %3725 = vst.msk [vmem:[#allocation2 + $0xf4] sm:$0xf] %vm3663_vm3, %v4512_v12  ;;  %3853 = vst.msk [vmem:[#allocation2 + $0x2f4] sm:$0xf] %vm3663_vm3, %v4640_v13  ;;  %v1617_v21 = vadd.f32 %v6001_v14, %v1616_v19  ;;  %v2129_v22 = vadd.f32 %v6001_v14, %v2128_v20  ;;  %v4908_v23 = vpop.f32.mrb[66].mxu0  ;;  %v5036_v24 = vpop.f32.mrb[66].mxu1 }
 0x160   :  { %v2449_v25 = vmax.f32 %v1625_v17, 0.0  ;;  %v2577_v26 = vmax.f32 %v2137_v18, 0.0  ;;  %v1628_v27 = vadd.f32 %v6001_v14, %v4908_v23  ;;  %v2140_v28 = vadd.f32 %v6001_v14, %v5036_v24  ;;  %v1619_v29 = vpop.f32.mrb[67].mxu0  ;;  %v2131_v30 = vpop.f32.mrb[67].mxu1 }
 0x161   :  { %v2447_v31 = vmax.f32 %v1617_v21, 0.0  ;;  %v2575_v32 = vmax.f32 %v2129_v22, 0.0  ;;  %v1620_v33 = vadd.f32 %v6001_v14, %v1619_v29  ;;  %v2132_v34 = vadd.f32 %v6001_v14, %v2131_v30 }
 0x162   :  { %v4517_v35 = vpack.c.bf16 %v2449_v25, %v2449_v25  ;;  %v4645_v36 = vpack.c.bf16 %v2577_v26, %v2577_v26  ;;  %v2450_v37 = vmax.f32 %v1628_v27, 0.0  ;;  %v2578_v38 = vmax.f32 %v2140_v28, 0.0 }
 0x163   :  { %v4515_v39 = vpack.c.bf16 %v2447_v31, %v2447_v31  ;;  %v4643_v40 = vpack.c.bf16 %v2575_v32, %v2575_v32  ;;  %v2448_v41 = vmax.f32 %v1620_v33, 0.0  ;;  %v2576_v42 = vmax.f32 %v2132_v34, 0.0 }
 0x164   :  { %3730 = vst.msk [vmem:[#allocation2 + $0x108] sm:$0xf] %vm3663_vm3, %v4517_v35  ;;  %3858 = vst.msk [vmem:[#allocation2 + $0x308] sm:$0xf] %vm3663_vm3, %v4645_v36  ;;  %v4518_v43 = vpack.c.bf16 %v2450_v37, %v2450_v37  ;;  %v4646_v44 = vpack.c.bf16 %v2578_v38, %v2578_v38 }
 0x165   :  { %3728 = vst.msk [vmem:[#allocation2 + $0x100] sm:$0xf] %vm3663_vm3, %v4515_v39  ;;  %3856 = vst.msk [vmem:[#allocation2 + $0x300] sm:$0xf] %vm3663_vm3, %v4643_v40  ;;  %v4516_v45 = vpack.c.bf16 %v2448_v41, %v2448_v41  ;;  %v4644_v46 = vpack.c.bf16 %v2576_v42, %v2576_v42  ;;  %v4911_v47 = vpop.f32.mrb[68].mxu0  ;;  %v5039_v48 = vpop.f32.mrb[68].mxu1 }
 0x166   :  { %3731 = vst.msk [vmem:[#allocation2 + $0x10c] sm:$0xf] %vm3663_vm3, %v4518_v43  ;;  %3859 = vst.msk [vmem:[#allocation2 + $0x30c] sm:$0xf] %vm3663_vm3, %v4646_v44  ;;  %v1641_v49 = vadd.f32 %v6001_v14, %v4911_v47  ;;  %v2153_v50 = vadd.f32 %v6001_v14, %v5039_v48  ;;  %v1632_v51 = vpop.f32.mrb[69].mxu0  ;;  %v2144_v53 = vpop.f32.mrb[69].mxu1 }
 0x167   :  { %3729 = vst.msk [vmem:[#allocation2 + $0x104] sm:$0xf] %vm3663_vm3, %v4516_v45  ;;  %3857 = vst.msk [vmem:[#allocation2 + $0x304] sm:$0xf] %vm3663_vm3, %v4644_v46  ;;  %v1633_v54 = vadd.f32 %v6001_v14, %v1632_v51  ;;  %v2145_v55 = vadd.f32 %v6001_v14, %v2144_v53  ;;  %v4912_v56 = vpop.f32.mrb[70].mxu0  ;;  %v5040_v57 = vpop.f32.mrb[70].mxu1 }
 0x168   :  { %v2453_v58 = vmax.f32 %v1641_v49, 0.0  ;;  %v2581_v59 = vmax.f32 %v2153_v50, 0.0  ;;  %v1644_v60 = vadd.f32 %v6001_v14, %v4912_v56  ;;  %v2156_v61 = vadd.f32 %v6001_v14, %v5040_v57  ;;  %v1635_v62 = vpop.f32.mrb[71].mxu0  ;;  %v2147_v63 = vpop.f32.mrb[71].mxu1 }
 0x169   :  { %v2451_v0 = vmax.f32 %v1633_v54, 0.0  ;;  %v2579_v1 = vmax.f32 %v2145_v55, 0.0  ;;  %v1636_v2 = vadd.f32 %v6001_v14, %v1635_v62  ;;  %v2148_v3 = vadd.f32 %v6001_v14, %v2147_v63 }
 0x16a   :  { %v4521_v4 = vpack.c.bf16 %v2453_v58, %v2453_v58  ;;  %v4649_v5 = vpack.c.bf16 %v2581_v59, %v2581_v59  ;;  %v2454_v6 = vmax.f32 %v1644_v60, 0.0  ;;  %v2582_v7 = vmax.f32 %v2156_v61, 0.0 }
 0x16b   :  { %v4519_v8 = vpack.c.bf16 %v2451_v0, %v2451_v0  ;;  %v4647_v9 = vpack.c.bf16 %v2579_v1, %v2579_v1  ;;  %v2452_v10 = vmax.f32 %v1636_v2, 0.0  ;;  %v2580_v11 = vmax.f32 %v2148_v3, 0.0 }
 0x16c   :  { %3734 = vst.msk [vmem:[#allocation2 + $0x118] sm:$0xf] %vm3663_vm3, %v4521_v4  ;;  %3862 = vst.msk [vmem:[#allocation2 + $0x318] sm:$0xf] %vm3663_vm3, %v4649_v5  ;;  %v4522_v52 = vpack.c.bf16 %v2454_v6, %v2454_v6  ;;  %v4650_v12 = vpack.c.bf16 %v2582_v7, %v2582_v7 }
 0x16d   :  { %3732 = vst.msk [vmem:[#allocation2 + $0x110] sm:$0xf] %vm3663_vm3, %v4519_v8  ;;  %3860 = vst.msk [vmem:[#allocation2 + $0x310] sm:$0xf] %vm3663_vm3, %v4647_v9  ;;  %v4520_v13 = vpack.c.bf16 %v2452_v10, %v2452_v10  ;;  %v4648_v15 = vpack.c.bf16 %v2580_v11, %v2580_v11  ;;  %v4915_v16 = vpop.f32.mrb[72].mxu0  ;;  %v5043_v17 = vpop.f32.mrb[72].mxu1 }
 0x16e   :  { %3735 = vst.msk [vmem:[#allocation2 + $0x11c] sm:$0xf] %vm3663_vm3, %v4522_v52  ;;  %3863 = vst.msk [vmem:[#allocation2 + $0x31c] sm:$0xf] %vm3663_vm3, %v4650_v12  ;;  %v1657_v18 = vadd.f32 %v6001_v14, %v4915_v16  ;;  %v2169_v19 = vadd.f32 %v6001_v14, %v5043_v17  ;;  %v1648_v20 = vpop.f32.mrb[73].mxu0  ;;  %v2160_v21 = vpop.f32.mrb[73].mxu1 }
 0x16f   :  { %3733 = vst.msk [vmem:[#allocation2 + $0x114] sm:$0xf] %vm3663_vm3, %v4520_v13  ;;  %3861 = vst.msk [vmem:[#allocation2 + $0x314] sm:$0xf] %vm3663_vm3, %v4648_v15  ;;  %v1649_v22 = vadd.f32 %v6001_v14, %v1648_v20  ;;  %v2161_v23 = vadd.f32 %v6001_v14, %v2160_v21  ;;  %v4916_v24 = vpop.f32.mrb[74].mxu0  ;;  %v5044_v25 = vpop.f32.mrb[74].mxu1 }
 0x170   :  { %v2457_v26 = vmax.f32 %v1657_v18, 0.0  ;;  %v2585_v27 = vmax.f32 %v2169_v19, 0.0  ;;  %v1660_v28 = vadd.f32 %v6001_v14, %v4916_v24  ;;  %v2172_v29 = vadd.f32 %v6001_v14, %v5044_v25  ;;  %v1651_v30 = vpop.f32.mrb[75].mxu0  ;;  %v2163_v31 = vpop.f32.mrb[75].mxu1 }
 0x171   :  { %v2455_v32 = vmax.f32 %v1649_v22, 0.0  ;;  %v2583_v33 = vmax.f32 %v2161_v23, 0.0  ;;  %v1652_v34 = vadd.f32 %v6001_v14, %v1651_v30  ;;  %v2164_v35 = vadd.f32 %v6001_v14, %v2163_v31 }
 0x172   :  { %v4525_v36 = vpack.c.bf16 %v2457_v26, %v2457_v26  ;;  %v4653_v37 = vpack.c.bf16 %v2585_v27, %v2585_v27  ;;  %v2458_v38 = vmax.f32 %v1660_v28, 0.0  ;;  %v2586_v39 = vmax.f32 %v2172_v29, 0.0 }
 0x173   :  { %v4523_v40 = vpack.c.bf16 %v2455_v32, %v2455_v32  ;;  %v4651_v41 = vpack.c.bf16 %v2583_v33, %v2583_v33  ;;  %v2456_v42 = vmax.f32 %v1652_v34, 0.0  ;;  %v2584_v43 = vmax.f32 %v2164_v35, 0.0 }
 0x174   :  { %3738 = vst.msk [vmem:[#allocation2 + $0x128] sm:$0xf] %vm3663_vm3, %v4525_v36  ;;  %3866 = vst.msk [vmem:[#allocation2 + $0x328] sm:$0xf] %vm3663_vm3, %v4653_v37  ;;  %v4526_v44 = vpack.c.bf16 %v2458_v38, %v2458_v38  ;;  %v4654_v45 = vpack.c.bf16 %v2586_v39, %v2586_v39 }
 0x175   :  { %3736 = vst.msk [vmem:[#allocation2 + $0x120] sm:$0xf] %vm3663_vm3, %v4523_v40  ;;  %3864 = vst.msk [vmem:[#allocation2 + $0x320] sm:$0xf] %vm3663_vm3, %v4651_v41  ;;  %v4524_v46 = vpack.c.bf16 %v2456_v42, %v2456_v42  ;;  %v4652_v47 = vpack.c.bf16 %v2584_v43, %v2584_v43  ;;  %v4919_v48 = vpop.f32.mrb[76].mxu0  ;;  %v5047_v49 = vpop.f32.mrb[76].mxu1 }
 0x176   :  { %3739 = vst.msk [vmem:[#allocation2 + $0x12c] sm:$0xf] %vm3663_vm3, %v4526_v44  ;;  %3867 = vst.msk [vmem:[#allocation2 + $0x32c] sm:$0xf] %vm3663_vm3, %v4654_v45  ;;  %v1673_v50 = vadd.f32 %v6001_v14, %v4919_v48  ;;  %v2185_v51 = vadd.f32 %v6001_v14, %v5047_v49  ;;  %v1664_v53 = vpop.f32.mrb[77].mxu0  ;;  %v2176_v54 = vpop.f32.mrb[77].mxu1 }
 0x177   :  { %3737 = vst.msk [vmem:[#allocation2 + $0x124] sm:$0xf] %vm3663_vm3, %v4524_v46  ;;  %3865 = vst.msk [vmem:[#allocation2 + $0x324] sm:$0xf] %vm3663_vm3, %v4652_v47  ;;  %v1665_v55 = vadd.f32 %v6001_v14, %v1664_v53  ;;  %v2177_v56 = vadd.f32 %v6001_v14, %v2176_v54  ;;  %v4920_v57 = vpop.f32.mrb[78].mxu0  ;;  %v5048_v58 = vpop.f32.mrb[78].mxu1 }
 0x178   :  { %v2461_v59 = vmax.f32 %v1673_v50, 0.0  ;;  %v2589_v60 = vmax.f32 %v2185_v51, 0.0  ;;  %v1676_v61 = vadd.f32 %v6001_v14, %v4920_v57  ;;  %v2188_v62 = vadd.f32 %v6001_v14, %v5048_v58  ;;  %v1667_v63 = vpop.f32.mrb[79].mxu0  ;;  %v2179_v0 = vpop.f32.mrb[79].mxu1 }
 0x179   :  { %v2459_v1 = vmax.f32 %v1665_v55, 0.0  ;;  %v2587_v2 = vmax.f32 %v2177_v56, 0.0  ;;  %v1668_v3 = vadd.f32 %v6001_v14, %v1667_v63  ;;  %v2180_v4 = vadd.f32 %v6001_v14, %v2179_v0 }
 0x17a   :  { %v4529_v5 = vpack.c.bf16 %v2461_v59, %v2461_v59  ;;  %v4657_v6 = vpack.c.bf16 %v2589_v60, %v2589_v60  ;;  %v2462_v7 = vmax.f32 %v1676_v61, 0.0  ;;  %v2590_v8 = vmax.f32 %v2188_v62, 0.0 }
 0x17b   :  { %v4527_v9 = vpack.c.bf16 %v2459_v1, %v2459_v1  ;;  %v4655_v10 = vpack.c.bf16 %v2587_v2, %v2587_v2  ;;  %v2460_v11 = vmax.f32 %v1668_v3, 0.0  ;;  %v2588_v52 = vmax.f32 %v2180_v4, 0.0 }
 0x17c   :  { %3742 = vst.msk [vmem:[#allocation2 + $0x138] sm:$0xf] %vm3663_vm3, %v4529_v5  ;;  %3870 = vst.msk [vmem:[#allocation2 + $0x338] sm:$0xf] %vm3663_vm3, %v4657_v6  ;;  %v4530_v12 = vpack.c.bf16 %v2462_v7, %v2462_v7  ;;  %v4658_v13 = vpack.c.bf16 %v2590_v8, %v2590_v8 }
 0x17d   :  { %3740 = vst.msk [vmem:[#allocation2 + $0x130] sm:$0xf] %vm3663_vm3, %v4527_v9  ;;  %3868 = vst.msk [vmem:[#allocation2 + $0x330] sm:$0xf] %vm3663_vm3, %v4655_v10  ;;  %v4528_v15 = vpack.c.bf16 %v2460_v11, %v2460_v11  ;;  %v4656_v16 = vpack.c.bf16 %v2588_v52, %v2588_v52  ;;  %v4923_v17 = vpop.f32.mrb[80].mxu0  ;;  %v5051_v18 = vpop.f32.mrb[80].mxu1 }
 0x17e   :  { %3743 = vst.msk [vmem:[#allocation2 + $0x13c] sm:$0xf] %vm3663_vm3, %v4530_v12  ;;  %3871 = vst.msk [vmem:[#allocation2 + $0x33c] sm:$0xf] %vm3663_vm3, %v4658_v13  ;;  %v1689_v19 = vadd.f32 %v6001_v14, %v4923_v17  ;;  %v2201_v20 = vadd.f32 %v6001_v14, %v5051_v18  ;;  %v1680_v21 = vpop.f32.mrb[81].mxu0  ;;  %v2192_v22 = vpop.f32.mrb[81].mxu1 }
 0x17f   :  { %3741 = vst.msk [vmem:[#allocation2 + $0x134] sm:$0xf] %vm3663_vm3, %v4528_v15  ;;  %3869 = vst.msk [vmem:[#allocation2 + $0x334] sm:$0xf] %vm3663_vm3, %v4656_v16  ;;  %v1681_v23 = vadd.f32 %v6001_v14, %v1680_v21  ;;  %v2193_v24 = vadd.f32 %v6001_v14, %v2192_v22  ;;  %v4924_v25 = vpop.f32.mrb[82].mxu0  ;;  %v5052_v26 = vpop.f32.mrb[82].mxu1 }
 0x180   :  { %v2465_v27 = vmax.f32 %v1689_v19, 0.0  ;;  %v2593_v28 = vmax.f32 %v2201_v20, 0.0  ;;  %v1692_v29 = vadd.f32 %v6001_v14, %v4924_v25  ;;  %v2204_v30 = vadd.f32 %v6001_v14, %v5052_v26  ;;  %v1683_v31 = vpop.f32.mrb[83].mxu0  ;;  %v2195_v32 = vpop.f32.mrb[83].mxu1 }
 0x181   :  { %v2463_v33 = vmax.f32 %v1681_v23, 0.0  ;;  %v2591_v34 = vmax.f32 %v2193_v24, 0.0  ;;  %v1684_v35 = vadd.f32 %v6001_v14, %v1683_v31  ;;  %v2196_v36 = vadd.f32 %v6001_v14, %v2195_v32 }
 0x182   :  { %v4533_v37 = vpack.c.bf16 %v2465_v27, %v2465_v27  ;;  %v4661_v38 = vpack.c.bf16 %v2593_v28, %v2593_v28  ;;  %v2466_v39 = vmax.f32 %v1692_v29, 0.0  ;;  %v2594_v40 = vmax.f32 %v2204_v30, 0.0 }
 0x183   :  { %v4531_v41 = vpack.c.bf16 %v2463_v33, %v2463_v33  ;;  %v4659_v42 = vpack.c.bf16 %v2591_v34, %v2591_v34  ;;  %v2464_v43 = vmax.f32 %v1684_v35, 0.0  ;;  %v2592_v44 = vmax.f32 %v2196_v36, 0.0 }
 0x184   :  { %3746 = vst.msk [vmem:[#allocation2 + $0x148] sm:$0xf] %vm3663_vm3, %v4533_v37  ;;  %3874 = vst.msk [vmem:[#allocation2 + $0x348] sm:$0xf] %vm3663_vm3, %v4661_v38  ;;  %v4534_v45 = vpack.c.bf16 %v2466_v39, %v2466_v39  ;;  %v4662_v46 = vpack.c.bf16 %v2594_v40, %v2594_v40 }
 0x185   :  { %3744 = vst.msk [vmem:[#allocation2 + $0x140] sm:$0xf] %vm3663_vm3, %v4531_v41  ;;  %3872 = vst.msk [vmem:[#allocation2 + $0x340] sm:$0xf] %vm3663_vm3, %v4659_v42  ;;  %v4532_v47 = vpack.c.bf16 %v2464_v43, %v2464_v43  ;;  %v4660_v48 = vpack.c.bf16 %v2592_v44, %v2592_v44  ;;  %v4927_v49 = vpop.f32.mrb[84].mxu0  ;;  %v5055_v50 = vpop.f32.mrb[84].mxu1 }
 0x186   :  { %3747 = vst.msk [vmem:[#allocation2 + $0x14c] sm:$0xf] %vm3663_vm3, %v4534_v45  ;;  %3875 = vst.msk [vmem:[#allocation2 + $0x34c] sm:$0xf] %vm3663_vm3, %v4662_v46  ;;  %v1705_v51 = vadd.f32 %v6001_v14, %v4927_v49  ;;  %v2217_v53 = vadd.f32 %v6001_v14, %v5055_v50  ;;  %v1696_v54 = vpop.f32.mrb[85].mxu0  ;;  %v2208_v55 = vpop.f32.mrb[85].mxu1 }
 0x187   :  { %3745 = vst.msk [vmem:[#allocation2 + $0x144] sm:$0xf] %vm3663_vm3, %v4532_v47  ;;  %3873 = vst.msk [vmem:[#allocation2 + $0x344] sm:$0xf] %vm3663_vm3, %v4660_v48  ;;  %v1697_v56 = vadd.f32 %v6001_v14, %v1696_v54  ;;  %v2209_v57 = vadd.f32 %v6001_v14, %v2208_v55  ;;  %v4928_v58 = vpop.f32.mrb[86].mxu0  ;;  %v5056_v59 = vpop.f32.mrb[86].mxu1 }
 0x188   :  { %v2469_v60 = vmax.f32 %v1705_v51, 0.0  ;;  %v2597_v61 = vmax.f32 %v2217_v53, 0.0  ;;  %v1708_v62 = vadd.f32 %v6001_v14, %v4928_v58  ;;  %v2220_v63 = vadd.f32 %v6001_v14, %v5056_v59  ;;  %v1699_v0 = vpop.f32.mrb[87].mxu0  ;;  %v2211_v1 = vpop.f32.mrb[87].mxu1 }
 0x189   :  { %v2467_v2 = vmax.f32 %v1697_v56, 0.0  ;;  %v2595_v3 = vmax.f32 %v2209_v57, 0.0  ;;  %v1700_v4 = vadd.f32 %v6001_v14, %v1699_v0  ;;  %v2212_v5 = vadd.f32 %v6001_v14, %v2211_v1 }
 0x18a   :  { %v4537_v6 = vpack.c.bf16 %v2469_v60, %v2469_v60  ;;  %v4665_v7 = vpack.c.bf16 %v2597_v61, %v2597_v61  ;;  %v2470_v8 = vmax.f32 %v1708_v62, 0.0  ;;  %v2598_v9 = vmax.f32 %v2220_v63, 0.0 }
 0x18b   :  { %v4535_v10 = vpack.c.bf16 %v2467_v2, %v2467_v2  ;;  %v4663_v11 = vpack.c.bf16 %v2595_v3, %v2595_v3  ;;  %v2468_v52 = vmax.f32 %v1700_v4, 0.0  ;;  %v2596_v12 = vmax.f32 %v2212_v5, 0.0 }
 0x18c   :  { %3750 = vst.msk [vmem:[#allocation2 + $0x158] sm:$0xf] %vm3663_vm3, %v4537_v6  ;;  %3878 = vst.msk [vmem:[#allocation2 + $0x358] sm:$0xf] %vm3663_vm3, %v4665_v7  ;;  %v4538_v13 = vpack.c.bf16 %v2470_v8, %v2470_v8  ;;  %v4666_v15 = vpack.c.bf16 %v2598_v9, %v2598_v9 }
 0x18d   :  { %3748 = vst.msk [vmem:[#allocation2 + $0x150] sm:$0xf] %vm3663_vm3, %v4535_v10  ;;  %3876 = vst.msk [vmem:[#allocation2 + $0x350] sm:$0xf] %vm3663_vm3, %v4663_v11  ;;  %v4536_v16 = vpack.c.bf16 %v2468_v52, %v2468_v52  ;;  %v4664_v17 = vpack.c.bf16 %v2596_v12, %v2596_v12  ;;  %v4931_v18 = vpop.f32.mrb[88].mxu0  ;;  %v5059_v19 = vpop.f32.mrb[88].mxu1 }
 0x18e   :  { %3751 = vst.msk [vmem:[#allocation2 + $0x15c] sm:$0xf] %vm3663_vm3, %v4538_v13  ;;  %3879 = vst.msk [vmem:[#allocation2 + $0x35c] sm:$0xf] %vm3663_vm3, %v4666_v15  ;;  %v1721_v20 = vadd.f32 %v6001_v14, %v4931_v18  ;;  %v2233_v21 = vadd.f32 %v6001_v14, %v5059_v19  ;;  %v1712_v22 = vpop.f32.mrb[89].mxu0  ;;  %v2224_v23 = vpop.f32.mrb[89].mxu1 }
 0x18f   :  { %3749 = vst.msk [vmem:[#allocation2 + $0x154] sm:$0xf] %vm3663_vm3, %v4536_v16  ;;  %3877 = vst.msk [vmem:[#allocation2 + $0x354] sm:$0xf] %vm3663_vm3, %v4664_v17  ;;  %v1713_v24 = vadd.f32 %v6001_v14, %v1712_v22  ;;  %v2225_v25 = vadd.f32 %v6001_v14, %v2224_v23  ;;  %v4932_v26 = vpop.f32.mrb[90].mxu0  ;;  %v5060_v27 = vpop.f32.mrb[90].mxu1 }
 0x190   :  { %v2473_v28 = vmax.f32 %v1721_v20, 0.0  ;;  %v2601_v29 = vmax.f32 %v2233_v21, 0.0  ;;  %v1724_v30 = vadd.f32 %v6001_v14, %v4932_v26  ;;  %v2236_v31 = vadd.f32 %v6001_v14, %v5060_v27  ;;  %v1715_v32 = vpop.f32.mrb[91].mxu0  ;;  %v2227_v33 = vpop.f32.mrb[91].mxu1 }
 0x191   :  { %v2471_v34 = vmax.f32 %v1713_v24, 0.0  ;;  %v2599_v35 = vmax.f32 %v2225_v25, 0.0  ;;  %v1716_v36 = vadd.f32 %v6001_v14, %v1715_v32  ;;  %v2228_v37 = vadd.f32 %v6001_v14, %v2227_v33 }
 0x192   :  { %v4541_v38 = vpack.c.bf16 %v2473_v28, %v2473_v28  ;;  %v4669_v39 = vpack.c.bf16 %v2601_v29, %v2601_v29  ;;  %v2474_v40 = vmax.f32 %v1724_v30, 0.0  ;;  %v2602_v41 = vmax.f32 %v2236_v31, 0.0 }
 0x193   :  { %v4539_v42 = vpack.c.bf16 %v2471_v34, %v2471_v34  ;;  %v4667_v43 = vpack.c.bf16 %v2599_v35, %v2599_v35  ;;  %v2472_v44 = vmax.f32 %v1716_v36, 0.0  ;;  %v2600_v45 = vmax.f32 %v2228_v37, 0.0 }
 0x194   :  { %3754 = vst.msk [vmem:[#allocation2 + $0x168] sm:$0xf] %vm3663_vm3, %v4541_v38  ;;  %3882 = vst.msk [vmem:[#allocation2 + $0x368] sm:$0xf] %vm3663_vm3, %v4669_v39  ;;  %v4542_v46 = vpack.c.bf16 %v2474_v40, %v2474_v40  ;;  %v4670_v47 = vpack.c.bf16 %v2602_v41, %v2602_v41 }
 0x195   :  { %3752 = vst.msk [vmem:[#allocation2 + $0x160] sm:$0xf] %vm3663_vm3, %v4539_v42  ;;  %3880 = vst.msk [vmem:[#allocation2 + $0x360] sm:$0xf] %vm3663_vm3, %v4667_v43  ;;  %v4540_v48 = vpack.c.bf16 %v2472_v44, %v2472_v44  ;;  %v4668_v49 = vpack.c.bf16 %v2600_v45, %v2600_v45  ;;  %v4935_v50 = vpop.f32.mrb[92].mxu0  ;;  %v5063_v51 = vpop.f32.mrb[92].mxu1 }
 0x196   :  { %3755 = vst.msk [vmem:[#allocation2 + $0x16c] sm:$0xf] %vm3663_vm3, %v4542_v46  ;;  %3883 = vst.msk [vmem:[#allocation2 + $0x36c] sm:$0xf] %vm3663_vm3, %v4670_v47  ;;  %v1737_v53 = vadd.f32 %v6001_v14, %v4935_v50  ;;  %v2249_v54 = vadd.f32 %v6001_v14, %v5063_v51  ;;  %v1728_v55 = vpop.f32.mrb[93].mxu0  ;;  %v2240_v56 = vpop.f32.mrb[93].mxu1 }
 0x197   :  { %3753 = vst.msk [vmem:[#allocation2 + $0x164] sm:$0xf] %vm3663_vm3, %v4540_v48  ;;  %3881 = vst.msk [vmem:[#allocation2 + $0x364] sm:$0xf] %vm3663_vm3, %v4668_v49  ;;  %v1729_v57 = vadd.f32 %v6001_v14, %v1728_v55  ;;  %v2241_v58 = vadd.f32 %v6001_v14, %v2240_v56  ;;  %v4936_v59 = vpop.f32.mrb[94].mxu0  ;;  %v5064_v60 = vpop.f32.mrb[94].mxu1 }
 0x198   :  { %v2477_v61 = vmax.f32 %v1737_v53, 0.0  ;;  %v2605_v62 = vmax.f32 %v2249_v54, 0.0  ;;  %v1740_v63 = vadd.f32 %v6001_v14, %v4936_v59  ;;  %v2252_v0 = vadd.f32 %v6001_v14, %v5064_v60  ;;  %v1731_v1 = vpop.f32.mrb[95].mxu0  ;;  %v2243_v2 = vpop.f32.mrb[95].mxu1  ;;  %v6214_v53 = vld [vmem:[%s6344_s2] ss:$0 sm:$0xff] }
 0x199   :  { %v2475_v3 = vmax.f32 %v1729_v57, 0.0  ;;  %v2603_v4 = vmax.f32 %v2241_v58, 0.0  ;;  %v1732_v5 = vadd.f32 %v6001_v14, %v1731_v1  ;;  %v2244_v6 = vadd.f32 %v6001_v14, %v2243_v2  ;;  %s5262_s2 = smov [#allocation2]  }
 0x19a   :  { %v4545_v7 = vpack.c.bf16 %v2477_v61, %v2477_v61  ;;  %v4673_v8 = vpack.c.bf16 %v2605_v62, %v2605_v62  ;;  %v2478_v9 = vmax.f32 %v1740_v63, 0.0  ;;  %v2606_v10 = vmax.f32 %v2252_v0, 0.0  ;;  %s3925_s24 = sshll.u32 %s5262_s2, 4  ;;  %s3926_s24 = int_to_ptr.vmem [resolvable:$true] %s3925_s24 }
 0x19b   :  { %v4543_v11 = vpack.c.bf16 %v2475_v3, %v2475_v3  ;;  %v4671_v52 = vpack.c.bf16 %v2603_v4, %v2603_v4  ;;  %v2476_v12 = vmax.f32 %v1732_v5, 0.0  ;;  %v2604_v13 = vmax.f32 %v2244_v6, 0.0  ;;  %s5237_s25 = scalar_lea.vmem %s3926_s24, 16384  ;;  %p5242_p1 = scmp.lt.s32.totalorder %s3926_s24, %s3926_s24 }
 0x19c   :  { %3758 = vst.msk [vmem:[#allocation2 + $0x178] sm:$0xf] %vm3663_vm3, %v4545_v7  ;;  %3886 = vst.msk [vmem:[#allocation2 + $0x378] sm:$0xf] %vm3663_vm3, %v4673_v8  ;;  %v4546_v15 = vpack.c.bf16 %v2478_v9, %v2478_v9  ;;  %v4674_v16 = vpack.c.bf16 %v2606_v10, %v2606_v10  ;;  %p5238_p0 = scmp.ne.s32.totalorder %s3926_s24, %s5237_s25  ;;  %p5243_p2 = scmp.lt.s32.totalorder %s5237_s25, %s5237_s25 }
 0x19d   :  { %3756 = vst.msk [vmem:[#allocation2 + $0x170] sm:$0xf] %vm3663_vm3, %v4543_v11  ;;  %3884 = vst.msk [vmem:[#allocation2 + $0x370] sm:$0xf] %vm3663_vm3, %v4671_v52  ;;  %v4544_v17 = vpack.c.bf16 %v2476_v12, %v2476_v12  ;;  %v4672_v18 = vpack.c.bf16 %v2604_v13, %v2604_v13  ;;  %v4939_v19 = vpop.f32.mrb[96].mxu0  ;;  %v5067_v20 = vpop.f32.mrb[96].mxu1 }
 0x19e   :  { %3759 = vst.msk [vmem:[#allocation2 + $0x17c] sm:$0xf] %vm3663_vm3, %v4546_v15  ;;  %3887 = vst.msk [vmem:[#allocation2 + $0x37c] sm:$0xf] %vm3663_vm3, %v4674_v16  ;;  %v1753_v21 = vadd.f32 %v6001_v14, %v4939_v19  ;;  %v2265_v22 = vadd.f32 %v6001_v14, %v5067_v20  ;;  %v1744_v23 = vpop.f32.mrb[97].mxu0  ;;  %v2256_v24 = vpop.f32.mrb[97].mxu1  ;;  %p5244_p3 = por %p5243_p2, %p5242_p1 }
 0x19f   :  { %3757 = vst.msk [vmem:[#allocation2 + $0x174] sm:$0xf] %vm3663_vm3, %v4544_v17  ;;  %3885 = vst.msk [vmem:[#allocation2 + $0x374] sm:$0xf] %vm3663_vm3, %v4672_v18  ;;  %v1745_v25 = vadd.f32 %v6001_v14, %v1744_v23  ;;  %v2257_v26 = vadd.f32 %v6001_v14, %v2256_v24  ;;  %v4940_v27 = vpop.f32.mrb[98].mxu0  ;;  %v5068_v28 = vpop.f32.mrb[98].mxu1 }
 0x1a0   :  { %v2481_v29 = vmax.f32 %v1753_v21, 0.0  ;;  %v2609_v30 = vmax.f32 %v2265_v22, 0.0  ;;  %v1756_v31 = vadd.f32 %v6001_v14, %v4940_v27  ;;  %v2268_v32 = vadd.f32 %v6001_v14, %v5068_v28  ;;  %v1747_v33 = vpop.f32.mrb[99].mxu0  ;;  %v2259_v34 = vpop.f32.mrb[99].mxu1  ;;  %p5245_p4 = pnand %p5244_p3, %p5238_p0 }
 0x1a1   :  { %v2479_v35 = vmax.f32 %v1745_v25, 0.0  ;;  %v2607_v36 = vmax.f32 %v2257_v26, 0.0  ;;  %v1748_v37 = vadd.f32 %v6001_v14, %v1747_v33  ;;  %v2260_v38 = vadd.f32 %v6001_v14, %v2259_v34 }
 0x1a2   :  { %v4549_v39 = vpack.c.bf16 %v2481_v29, %v2481_v29  ;;  %v4677_v40 = vpack.c.bf16 %v2609_v30, %v2609_v30  ;;  %v2482_v41 = vmax.f32 %v1756_v31, 0.0  ;;  %v2610_v42 = vmax.f32 %v2268_v32, 0.0 }
 0x1a3   :  { %v4547_v43 = vpack.c.bf16 %v2479_v35, %v2479_v35  ;;  %v4675_v44 = vpack.c.bf16 %v2607_v36, %v2607_v36  ;;  %v2480_v45 = vmax.f32 %v1748_v37, 0.0  ;;  %v2608_v46 = vmax.f32 %v2260_v38, 0.0 }
 0x1a4   :  { %3762 = vst.msk [vmem:[#allocation2 + $0x188] sm:$0xf] %vm3663_vm3, %v4549_v39  ;;  %3890 = vst.msk [vmem:[#allocation2 + $0x388] sm:$0xf] %vm3663_vm3, %v4677_v40  ;;  %v4550_v47 = vpack.c.bf16 %v2482_v41, %v2482_v41  ;;  %v4678_v48 = vpack.c.bf16 %v2610_v42, %v2610_v42 }
 0x1a5   :  { %3760 = vst.msk [vmem:[#allocation2 + $0x180] sm:$0xf] %vm3663_vm3, %v4547_v43  ;;  %3888 = vst.msk [vmem:[#allocation2 + $0x380] sm:$0xf] %vm3663_vm3, %v4675_v44  ;;  %v4548_v49 = vpack.c.bf16 %v2480_v45, %v2480_v45  ;;  %v4676_v14 = vpack.c.bf16 %v2608_v46, %v2608_v46  ;;  %v4943_v50 = vpop.f32.mrb[100].mxu0  ;;  %v5071_v51 = vpop.f32.mrb[100].mxu1 }
 0x1a6   :  { %3763 = vst.msk [vmem:[#allocation2 + $0x18c] sm:$0xf] %vm3663_vm3, %v4550_v47  ;;  %3891 = vst.msk [vmem:[#allocation2 + $0x38c] sm:$0xf] %vm3663_vm3, %v4678_v48  ;;  %v1769_v54 = vadd.f32 %v6214_v53, %v4943_v50  ;;  %v2281_v55 = vadd.f32 %v6214_v53, %v5071_v51  ;;  %v1760_v56 = vpop.f32.mrb[101].mxu0  ;;  %v2272_v57 = vpop.f32.mrb[101].mxu1 }
 0x1a7   :  { %3761 = vst.msk [vmem:[#allocation2 + $0x184] sm:$0xf] %vm3663_vm3, %v4548_v49  ;;  %3889 = vst.msk [vmem:[#allocation2 + $0x384] sm:$0xf] %vm3663_vm3, %v4676_v14  ;;  %v1761_v58 = vadd.f32 %v6214_v53, %v1760_v56  ;;  %v2273_v59 = vadd.f32 %v6214_v53, %v2272_v57  ;;  %v4944_v60 = vpop.f32.mrb[102].mxu0  ;;  %v5072_v61 = vpop.f32.mrb[102].mxu1 }
 0x1a8   :  { %v2485_v62 = vmax.f32 %v1769_v54, 0.0  ;;  %v2613_v63 = vmax.f32 %v2281_v55, 0.0  ;;  %v1772_v0 = vadd.f32 %v6214_v53, %v4944_v60  ;;  %v2284_v1 = vadd.f32 %v6214_v53, %v5072_v61  ;;  %v1763_v2 = vpop.f32.mrb[103].mxu0  ;;  %v2275_v3 = vpop.f32.mrb[103].mxu1 }
 0x1a9   :  { %v2483_v4 = vmax.f32 %v1761_v58, 0.0  ;;  %v2611_v5 = vmax.f32 %v2273_v59, 0.0  ;;  %v1764_v6 = vadd.f32 %v6214_v53, %v1763_v2  ;;  %v2276_v7 = vadd.f32 %v6214_v53, %v2275_v3 }
 0x1aa   :  { %v4553_v8 = vpack.c.bf16 %v2485_v62, %v2485_v62  ;;  %v4681_v9 = vpack.c.bf16 %v2613_v63, %v2613_v63  ;;  %v2486_v10 = vmax.f32 %v1772_v0, 0.0  ;;  %v2614_v11 = vmax.f32 %v2284_v1, 0.0 }
 0x1ab   :  { %v4551_v52 = vpack.c.bf16 %v2483_v4, %v2483_v4  ;;  %v4679_v12 = vpack.c.bf16 %v2611_v5, %v2611_v5  ;;  %v2484_v13 = vmax.f32 %v1764_v6, 0.0  ;;  %v2612_v15 = vmax.f32 %v2276_v7, 0.0 }
 0x1ac   :  { %3766 = vst.msk [vmem:[#allocation2 + $0x198] sm:$0xf] %vm3663_vm3, %v4553_v8  ;;  %3894 = vst.msk [vmem:[#allocation2 + $0x398] sm:$0xf] %vm3663_vm3, %v4681_v9  ;;  %v4554_v16 = vpack.c.bf16 %v2486_v10, %v2486_v10  ;;  %v4682_v17 = vpack.c.bf16 %v2614_v11, %v2614_v11 }
 0x1ad   :  { %3764 = vst.msk [vmem:[#allocation2 + $0x190] sm:$0xf] %vm3663_vm3, %v4551_v52  ;;  %3892 = vst.msk [vmem:[#allocation2 + $0x390] sm:$0xf] %vm3663_vm3, %v4679_v12  ;;  %v4552_v18 = vpack.c.bf16 %v2484_v13, %v2484_v13  ;;  %v4680_v19 = vpack.c.bf16 %v2612_v15, %v2612_v15  ;;  %v4947_v20 = vpop.f32.mrb[104].mxu0  ;;  %v5075_v21 = vpop.f32.mrb[104].mxu1 }
 0x1ae   :  { %3767 = vst.msk [vmem:[#allocation2 + $0x19c] sm:$0xf] %vm3663_vm3, %v4554_v16  ;;  %3895 = vst.msk [vmem:[#allocation2 + $0x39c] sm:$0xf] %vm3663_vm3, %v4682_v17  ;;  %v1785_v22 = vadd.f32 %v6214_v53, %v4947_v20  ;;  %v2297_v23 = vadd.f32 %v6214_v53, %v5075_v21  ;;  %v1776_v24 = vpop.f32.mrb[105].mxu0  ;;  %v2288_v25 = vpop.f32.mrb[105].mxu1 }
 0x1af   :  { %3765 = vst.msk [vmem:[#allocation2 + $0x194] sm:$0xf] %vm3663_vm3, %v4552_v18  ;;  %3893 = vst.msk [vmem:[#allocation2 + $0x394] sm:$0xf] %vm3663_vm3, %v4680_v19  ;;  %v1777_v26 = vadd.f32 %v6214_v53, %v1776_v24  ;;  %v2289_v27 = vadd.f32 %v6214_v53, %v2288_v25  ;;  %v4948_v28 = vpop.f32.mrb[106].mxu0  ;;  %v5076_v29 = vpop.f32.mrb[106].mxu1 }
 0x1b0   :  { %v2489_v30 = vmax.f32 %v1785_v22, 0.0  ;;  %v2617_v31 = vmax.f32 %v2297_v23, 0.0  ;;  %v1788_v32 = vadd.f32 %v6214_v53, %v4948_v28  ;;  %v2300_v33 = vadd.f32 %v6214_v53, %v5076_v29  ;;  %v1779_v34 = vpop.f32.mrb[107].mxu0  ;;  %v2291_v35 = vpop.f32.mrb[107].mxu1 }
 0x1b1   :  { %v2487_v36 = vmax.f32 %v1777_v26, 0.0  ;;  %v2615_v37 = vmax.f32 %v2289_v27, 0.0  ;;  %v1780_v38 = vadd.f32 %v6214_v53, %v1779_v34  ;;  %v2292_v39 = vadd.f32 %v6214_v53, %v2291_v35 }
 0x1b2   :  { %v4557_v40 = vpack.c.bf16 %v2489_v30, %v2489_v30  ;;  %v4685_v41 = vpack.c.bf16 %v2617_v31, %v2617_v31  ;;  %v2490_v42 = vmax.f32 %v1788_v32, 0.0  ;;  %v2618_v43 = vmax.f32 %v2300_v33, 0.0 }
 0x1b3   :  { %v4555_v44 = vpack.c.bf16 %v2487_v36, %v2487_v36  ;;  %v4683_v45 = vpack.c.bf16 %v2615_v37, %v2615_v37  ;;  %v2488_v46 = vmax.f32 %v1780_v38, 0.0  ;;  %v2616_v47 = vmax.f32 %v2292_v39, 0.0 }
 0x1b4   :  { %3770 = vst.msk [vmem:[#allocation2 + $0x1a8] sm:$0xf] %vm3663_vm3, %v4557_v40  ;;  %3898 = vst.msk [vmem:[#allocation2 + $0x3a8] sm:$0xf] %vm3663_vm3, %v4685_v41  ;;  %v4558_v48 = vpack.c.bf16 %v2490_v42, %v2490_v42  ;;  %v4686_v49 = vpack.c.bf16 %v2618_v43, %v2618_v43 }
 0x1b5   :  { %3768 = vst.msk [vmem:[#allocation2 + $0x1a0] sm:$0xf] %vm3663_vm3, %v4555_v44  ;;  %3896 = vst.msk [vmem:[#allocation2 + $0x3a0] sm:$0xf] %vm3663_vm3, %v4683_v45  ;;  %v4556_v14 = vpack.c.bf16 %v2488_v46, %v2488_v46  ;;  %v4684_v50 = vpack.c.bf16 %v2616_v47, %v2616_v47  ;;  %v4951_v51 = vpop.f32.mrb[108].mxu0  ;;  %v5079_v54 = vpop.f32.mrb[108].mxu1 }
 0x1b6   :  { %3771 = vst.msk [vmem:[#allocation2 + $0x1ac] sm:$0xf] %vm3663_vm3, %v4558_v48  ;;  %3899 = vst.msk [vmem:[#allocation2 + $0x3ac] sm:$0xf] %vm3663_vm3, %v4686_v49  ;;  %v1801_v55 = vadd.f32 %v6214_v53, %v4951_v51  ;;  %v2313_v56 = vadd.f32 %v6214_v53, %v5079_v54  ;;  %v1792_v57 = vpop.f32.mrb[109].mxu0  ;;  %v2304_v58 = vpop.f32.mrb[109].mxu1 }
 0x1b7   :  { %3769 = vst.msk [vmem:[#allocation2 + $0x1a4] sm:$0xf] %vm3663_vm3, %v4556_v14  ;;  %3897 = vst.msk [vmem:[#allocation2 + $0x3a4] sm:$0xf] %vm3663_vm3, %v4684_v50  ;;  %v1793_v59 = vadd.f32 %v6214_v53, %v1792_v57  ;;  %v2305_v60 = vadd.f32 %v6214_v53, %v2304_v58  ;;  %v4952_v61 = vpop.f32.mrb[110].mxu0  ;;  %v5080_v62 = vpop.f32.mrb[110].mxu1 }
 0x1b8   :  { %v2493_v63 = vmax.f32 %v1801_v55, 0.0  ;;  %v2621_v0 = vmax.f32 %v2313_v56, 0.0  ;;  %v1804_v1 = vadd.f32 %v6214_v53, %v4952_v61  ;;  %v2316_v2 = vadd.f32 %v6214_v53, %v5080_v62  ;;  %v1795_v3 = vpop.f32.mrb[111].mxu0  ;;  %v2307_v4 = vpop.f32.mrb[111].mxu1 }
 0x1b9   :  { %v2491_v5 = vmax.f32 %v1793_v59, 0.0  ;;  %v2619_v6 = vmax.f32 %v2305_v60, 0.0  ;;  %v1796_v7 = vadd.f32 %v6214_v53, %v1795_v3  ;;  %v2308_v8 = vadd.f32 %v6214_v53, %v2307_v4 }
 0x1ba   :  { %v4561_v9 = vpack.c.bf16 %v2493_v63, %v2493_v63  ;;  %v4689_v10 = vpack.c.bf16 %v2621_v0, %v2621_v0  ;;  %v2494_v11 = vmax.f32 %v1804_v1, 0.0  ;;  %v2622_v52 = vmax.f32 %v2316_v2, 0.0 }
 0x1bb   :  { %v4559_v12 = vpack.c.bf16 %v2491_v5, %v2491_v5  ;;  %v4687_v13 = vpack.c.bf16 %v2619_v6, %v2619_v6  ;;  %v2492_v15 = vmax.f32 %v1796_v7, 0.0  ;;  %v2620_v16 = vmax.f32 %v2308_v8, 0.0 }
 0x1bc   :  { %3774 = vst.msk [vmem:[#allocation2 + $0x1b8] sm:$0xf] %vm3663_vm3, %v4561_v9  ;;  %3902 = vst.msk [vmem:[#allocation2 + $0x3b8] sm:$0xf] %vm3663_vm3, %v4689_v10  ;;  %v4562_v17 = vpack.c.bf16 %v2494_v11, %v2494_v11  ;;  %v4690_v18 = vpack.c.bf16 %v2622_v52, %v2622_v52 }
 0x1bd   :  { %3772 = vst.msk [vmem:[#allocation2 + $0x1b0] sm:$0xf] %vm3663_vm3, %v4559_v12  ;;  %3900 = vst.msk [vmem:[#allocation2 + $0x3b0] sm:$0xf] %vm3663_vm3, %v4687_v13  ;;  %v4560_v19 = vpack.c.bf16 %v2492_v15, %v2492_v15  ;;  %v4688_v20 = vpack.c.bf16 %v2620_v16, %v2620_v16  ;;  %v4955_v21 = vpop.f32.mrb[112].mxu0  ;;  %v5083_v22 = vpop.f32.mrb[112].mxu1 }
 0x1be   :  { %3775 = vst.msk [vmem:[#allocation2 + $0x1bc] sm:$0xf] %vm3663_vm3, %v4562_v17  ;;  %3903 = vst.msk [vmem:[#allocation2 + $0x3bc] sm:$0xf] %vm3663_vm3, %v4690_v18  ;;  %v1817_v23 = vadd.f32 %v6214_v53, %v4955_v21  ;;  %v2329_v24 = vadd.f32 %v6214_v53, %v5083_v22  ;;  %v1808_v25 = vpop.f32.mrb[113].mxu0  ;;  %v2320_v26 = vpop.f32.mrb[113].mxu1 }
 0x1bf   :  { %3773 = vst.msk [vmem:[#allocation2 + $0x1b4] sm:$0xf] %vm3663_vm3, %v4560_v19  ;;  %3901 = vst.msk [vmem:[#allocation2 + $0x3b4] sm:$0xf] %vm3663_vm3, %v4688_v20  ;;  %v1809_v27 = vadd.f32 %v6214_v53, %v1808_v25  ;;  %v2321_v28 = vadd.f32 %v6214_v53, %v2320_v26  ;;  %v4956_v29 = vpop.f32.mrb[114].mxu0  ;;  %v5084_v30 = vpop.f32.mrb[114].mxu1 }
 0x1c0   :  { %v2497_v31 = vmax.f32 %v1817_v23, 0.0  ;;  %v2625_v32 = vmax.f32 %v2329_v24, 0.0  ;;  %v1820_v33 = vadd.f32 %v6214_v53, %v4956_v29  ;;  %v2332_v34 = vadd.f32 %v6214_v53, %v5084_v30  ;;  %v1811_v35 = vpop.f32.mrb[115].mxu0  ;;  %v2323_v36 = vpop.f32.mrb[115].mxu1 }
 0x1c1   :  { %v2495_v37 = vmax.f32 %v1809_v27, 0.0  ;;  %v2623_v38 = vmax.f32 %v2321_v28, 0.0  ;;  %v1812_v39 = vadd.f32 %v6214_v53, %v1811_v35  ;;  %v2324_v40 = vadd.f32 %v6214_v53, %v2323_v36 }
 0x1c2   :  { %v4565_v41 = vpack.c.bf16 %v2497_v31, %v2497_v31  ;;  %v4693_v42 = vpack.c.bf16 %v2625_v32, %v2625_v32  ;;  %v2498_v43 = vmax.f32 %v1820_v33, 0.0  ;;  %v2626_v44 = vmax.f32 %v2332_v34, 0.0 }
 0x1c3   :  { %v4563_v45 = vpack.c.bf16 %v2495_v37, %v2495_v37  ;;  %v4691_v46 = vpack.c.bf16 %v2623_v38, %v2623_v38  ;;  %v2496_v47 = vmax.f32 %v1812_v39, 0.0  ;;  %v2624_v48 = vmax.f32 %v2324_v40, 0.0 }
 0x1c4   :  { %3778 = vst.msk [vmem:[#allocation2 + $0x1c8] sm:$0xf] %vm3663_vm3, %v4565_v41  ;;  %3906 = vst.msk [vmem:[#allocation2 + $0x3c8] sm:$0xf] %vm3663_vm3, %v4693_v42  ;;  %v4566_v49 = vpack.c.bf16 %v2498_v43, %v2498_v43  ;;  %v4694_v14 = vpack.c.bf16 %v2626_v44, %v2626_v44 }
 0x1c5   :  { %3776 = vst.msk [vmem:[#allocation2 + $0x1c0] sm:$0xf] %vm3663_vm3, %v4563_v45  ;;  %3904 = vst.msk [vmem:[#allocation2 + $0x3c0] sm:$0xf] %vm3663_vm3, %v4691_v46  ;;  %v4564_v50 = vpack.c.bf16 %v2496_v47, %v2496_v47  ;;  %v4692_v51 = vpack.c.bf16 %v2624_v48, %v2624_v48  ;;  %v4959_v54 = vpop.f32.mrb[116].mxu0  ;;  %v5087_v55 = vpop.f32.mrb[116].mxu1 }
 0x1c6   :  { %3779 = vst.msk [vmem:[#allocation2 + $0x1cc] sm:$0xf] %vm3663_vm3, %v4566_v49  ;;  %3907 = vst.msk [vmem:[#allocation2 + $0x3cc] sm:$0xf] %vm3663_vm3, %v4694_v14  ;;  %v1833_v56 = vadd.f32 %v6214_v53, %v4959_v54  ;;  %v2345_v57 = vadd.f32 %v6214_v53, %v5087_v55  ;;  %v1824_v58 = vpop.f32.mrb[117].mxu0  ;;  %v2336_v59 = vpop.f32.mrb[117].mxu1 }
 0x1c7   :  { %3777 = vst.msk [vmem:[#allocation2 + $0x1c4] sm:$0xf] %vm3663_vm3, %v4564_v50  ;;  %3905 = vst.msk [vmem:[#allocation2 + $0x3c4] sm:$0xf] %vm3663_vm3, %v4692_v51  ;;  %v1825_v60 = vadd.f32 %v6214_v53, %v1824_v58  ;;  %v2337_v61 = vadd.f32 %v6214_v53, %v2336_v59  ;;  %v4960_v62 = vpop.f32.mrb[118].mxu0  ;;  %v5088_v63 = vpop.f32.mrb[118].mxu1 }
 0x1c8   :  { %v2501_v0 = vmax.f32 %v1833_v56, 0.0  ;;  %v2629_v1 = vmax.f32 %v2345_v57, 0.0  ;;  %v1836_v2 = vadd.f32 %v6214_v53, %v4960_v62  ;;  %v2348_v3 = vadd.f32 %v6214_v53, %v5088_v63  ;;  %v1827_v4 = vpop.f32.mrb[119].mxu0  ;;  %v2339_v5 = vpop.f32.mrb[119].mxu1 }
 0x1c9   :  { %v2499_v6 = vmax.f32 %v1825_v60, 0.0  ;;  %v2627_v7 = vmax.f32 %v2337_v61, 0.0  ;;  %v1828_v8 = vadd.f32 %v6214_v53, %v1827_v4  ;;  %v2340_v9 = vadd.f32 %v6214_v53, %v2339_v5 }
 0x1ca   :  { %v4569_v10 = vpack.c.bf16 %v2501_v0, %v2501_v0  ;;  %v4697_v11 = vpack.c.bf16 %v2629_v1, %v2629_v1  ;;  %v2502_v52 = vmax.f32 %v1836_v2, 0.0  ;;  %v2630_v12 = vmax.f32 %v2348_v3, 0.0 }
 0x1cb   :  { %v4567_v13 = vpack.c.bf16 %v2499_v6, %v2499_v6  ;;  %v4695_v15 = vpack.c.bf16 %v2627_v7, %v2627_v7  ;;  %v2500_v16 = vmax.f32 %v1828_v8, 0.0  ;;  %v2628_v17 = vmax.f32 %v2340_v9, 0.0 }
 0x1cc   :  { %3782 = vst.msk [vmem:[#allocation2 + $0x1d8] sm:$0xf] %vm3663_vm3, %v4569_v10  ;;  %3910 = vst.msk [vmem:[#allocation2 + $0x3d8] sm:$0xf] %vm3663_vm3, %v4697_v11  ;;  %v4570_v18 = vpack.c.bf16 %v2502_v52, %v2502_v52  ;;  %v4698_v19 = vpack.c.bf16 %v2630_v12, %v2630_v12 }
 0x1cd   :  { %3780 = vst.msk [vmem:[#allocation2 + $0x1d0] sm:$0xf] %vm3663_vm3, %v4567_v13  ;;  %3908 = vst.msk [vmem:[#allocation2 + $0x3d0] sm:$0xf] %vm3663_vm3, %v4695_v15  ;;  %v4568_v20 = vpack.c.bf16 %v2500_v16, %v2500_v16  ;;  %v4696_v21 = vpack.c.bf16 %v2628_v17, %v2628_v17  ;;  %v4963_v22 = vpop.f32.mrb[120].mxu0  ;;  %v5091_v23 = vpop.f32.mrb[120].mxu1 }
 0x1ce   :  { %3783 = vst.msk [vmem:[#allocation2 + $0x1dc] sm:$0xf] %vm3663_vm3, %v4570_v18  ;;  %3911 = vst.msk [vmem:[#allocation2 + $0x3dc] sm:$0xf] %vm3663_vm3, %v4698_v19  ;;  %v1849_v24 = vadd.f32 %v6214_v53, %v4963_v22  ;;  %v2361_v25 = vadd.f32 %v6214_v53, %v5091_v23  ;;  %v1840_v26 = vpop.f32.mrb[121].mxu0  ;;  %v2352_v27 = vpop.f32.mrb[121].mxu1 }
 0x1cf   :  { %3781 = vst.msk [vmem:[#allocation2 + $0x1d4] sm:$0xf] %vm3663_vm3, %v4568_v20  ;;  %3909 = vst.msk [vmem:[#allocation2 + $0x3d4] sm:$0xf] %vm3663_vm3, %v4696_v21  ;;  %v1841_v28 = vadd.f32 %v6214_v53, %v1840_v26  ;;  %v2353_v29 = vadd.f32 %v6214_v53, %v2352_v27  ;;  %v4964_v30 = vpop.f32.mrb[122].mxu0  ;;  %v5092_v31 = vpop.f32.mrb[122].mxu1 }
 0x1d0   :  { %v2505_v32 = vmax.f32 %v1849_v24, 0.0  ;;  %v2633_v33 = vmax.f32 %v2361_v25, 0.0  ;;  %v1852_v34 = vadd.f32 %v6214_v53, %v4964_v30  ;;  %v2364_v35 = vadd.f32 %v6214_v53, %v5092_v31  ;;  %v1843_v36 = vpop.f32.mrb[123].mxu0  ;;  %v2355_v37 = vpop.f32.mrb[123].mxu1 }
 0x1d1   :  { %v2503_v38 = vmax.f32 %v1841_v28, 0.0  ;;  %v2631_v39 = vmax.f32 %v2353_v29, 0.0  ;;  %v1844_v40 = vadd.f32 %v6214_v53, %v1843_v36  ;;  %v2356_v41 = vadd.f32 %v6214_v53, %v2355_v37 }
 0x1d2   :  { %v4573_v42 = vpack.c.bf16 %v2505_v32, %v2505_v32  ;;  %v4701_v43 = vpack.c.bf16 %v2633_v33, %v2633_v33  ;;  %v2506_v44 = vmax.f32 %v1852_v34, 0.0  ;;  %v2634_v45 = vmax.f32 %v2364_v35, 0.0 }
 0x1d3   :  { %v4571_v46 = vpack.c.bf16 %v2503_v38, %v2503_v38  ;;  %v4699_v47 = vpack.c.bf16 %v2631_v39, %v2631_v39  ;;  %v2504_v48 = vmax.f32 %v1844_v40, 0.0  ;;  %v2632_v49 = vmax.f32 %v2356_v41, 0.0 }
 0x1d4   :  { %3786 = vst.msk [vmem:[#allocation2 + $0x1e8] sm:$0xf] %vm3663_vm3, %v4573_v42  ;;  %3914 = vst.msk [vmem:[#allocation2 + $0x3e8] sm:$0xf] %vm3663_vm3, %v4701_v43  ;;  %v4574_v14 = vpack.c.bf16 %v2506_v44, %v2506_v44  ;;  %v4702_v50 = vpack.c.bf16 %v2634_v45, %v2634_v45 }
 0x1d5   :  { %3784 = vst.msk [vmem:[#allocation2 + $0x1e0] sm:$0xf] %vm3663_vm3, %v4571_v46  ;;  %3912 = vst.msk [vmem:[#allocation2 + $0x3e0] sm:$0xf] %vm3663_vm3, %v4699_v47  ;;  %v4572_v51 = vpack.c.bf16 %v2504_v48, %v2504_v48  ;;  %v4700_v54 = vpack.c.bf16 %v2632_v49, %v2632_v49  ;;  %v4967_v55 = vpop.f32.mrb[124].mxu0  ;;  %v5095_v56 = vpop.f32.mrb[124].mxu1 }
 0x1d6   :  { %3787 = vst.msk [vmem:[#allocation2 + $0x1ec] sm:$0xf] %vm3663_vm3, %v4574_v14  ;;  %3915 = vst.msk [vmem:[#allocation2 + $0x3ec] sm:$0xf] %vm3663_vm3, %v4702_v50  ;;  %v1865_v57 = vadd.f32 %v6214_v53, %v4967_v55  ;;  %v2377_v58 = vadd.f32 %v6214_v53, %v5095_v56  ;;  %v1856_v59 = vpop.f32.mrb[125].mxu0  ;;  %v2368_v60 = vpop.f32.mrb[125].mxu1 }
 0x1d7   :  { %3785 = vst.msk [vmem:[#allocation2 + $0x1e4] sm:$0xf] %vm3663_vm3, %v4572_v51  ;;  %3913 = vst.msk [vmem:[#allocation2 + $0x3e4] sm:$0xf] %vm3663_vm3, %v4700_v54  ;;  %v1857_v61 = vadd.f32 %v6214_v53, %v1856_v59  ;;  %v2369_v62 = vadd.f32 %v6214_v53, %v2368_v60  ;;  %v4968_v63 = vpop.f32.mrb[126].mxu0  ;;  %v5096_v0 = vpop.f32.mrb[126].mxu1 }
 0x1d8   :  { %v2509_v1 = vmax.f32 %v1865_v57, 0.0  ;;  %v2637_v2 = vmax.f32 %v2377_v58, 0.0  ;;  %v1868_v3 = vadd.f32 %v6214_v53, %v4968_v63  ;;  %v2380_v4 = vadd.f32 %v6214_v53, %v5096_v0  ;;  %v1859_v5 = vpop.f32.mrb[127].mxu0  ;;  %v2371_v6 = vpop.f32.mrb[127].mxu1 }
 0x1d9   :  { %v2507_v7 = vmax.f32 %v1857_v61, 0.0  ;;  %v2635_v8 = vmax.f32 %v2369_v62, 0.0  ;;  %v1860_v9 = vadd.f32 %v6214_v53, %v1859_v5  ;;  %v2372_v10 = vadd.f32 %v6214_v53, %v2371_v6 }
 0x1da   :  { %v4577_v11 = vpack.c.bf16 %v2509_v1, %v2509_v1  ;;  %v4705_v52 = vpack.c.bf16 %v2637_v2, %v2637_v2  ;;  %v2510_v12 = vmax.f32 %v1868_v3, 0.0  ;;  %v2638_v13 = vmax.f32 %v2380_v4, 0.0 }
 0x1db   :  { %v4575_v15 = vpack.c.bf16 %v2507_v7, %v2507_v7  ;;  %v4703_v16 = vpack.c.bf16 %v2635_v8, %v2635_v8  ;;  %v2508_v17 = vmax.f32 %v1860_v9, 0.0  ;;  %v2636_v18 = vmax.f32 %v2372_v10, 0.0 }
 0x1dc   :  { %3790 = vst.msk [vmem:[#allocation2 + $0x1f8] sm:$0xf] %vm3663_vm3, %v4577_v11  ;;  %3918 = vst.msk [vmem:[#allocation2 + $0x3f8] sm:$0xf] %vm3663_vm3, %v4705_v52  ;;  %v4578_v19 = vpack.c.bf16 %v2510_v12, %v2510_v12  ;;  %v4706_v20 = vpack.c.bf16 %v2638_v13, %v2638_v13 }
 0x1dd   :  { %3788 = vst.msk [vmem:[#allocation2 + $0x1f0] sm:$0xf] %vm3663_vm3, %v4575_v15  ;;  %3916 = vst.msk [vmem:[#allocation2 + $0x3f0] sm:$0xf] %vm3663_vm3, %v4703_v16  ;;  %v4576_v53 = vpack.c.bf16 %v2508_v17, %v2508_v17  ;;  %v4704_v21 = vpack.c.bf16 %v2636_v18, %v2636_v18 }
 0x1de   :  { %3791 = vst.msk [vmem:[#allocation2 + $0x1fc] sm:$0xf] %vm3663_vm3, %v4578_v19  ;;  %3919 = vst.msk [vmem:[#allocation2 + $0x3fc] sm:$0xf] %vm3663_vm3, %v4706_v20 }
 0x1df   :  { %3789 = vst.msk [vmem:[#allocation2 + $0x1f4] sm:$0xf] %vm3663_vm3, %v4576_v53  ;;  %3917 = vst.msk [vmem:[#allocation2 + $0x3f4] sm:$0xf] %vm3663_vm3, %v4704_v21 }
 0x1e0   :  { %5248 = shalt.err (!%p5245_p4)
}
 0x1e1   :  { %s5249_s28 = scalar_lea.hbm %s6345_s3, 16384 }
 0x1e2   :  { %p5250_p5 = scmp.ne.s32.totalorder %s6345_s3, %s5249_s28  ;;  %p5253_p6 = scmp.lt.u32.totalorder %s5249_s28, %s6345_s3 }
 0x1e4   :  { %p5255_p7 = pnand %p5253_p6, %p5250_p5 }
 0x1e6   :  { %5258 = shalt.err (!%p5255_p7)
}
 0x1e7   :  { %s5263_s6 = smov 64   ;;  %s5264_s7 = smov 4  }
 0x1e8   :  { %3931 = dma.vmem_to_hbm [thread:$0]  %s3926_s24, 16384, %s6345_s3, [#allocation3], %s5263_s6, %s5263_s6, %s5264_s7  }
 0x1e9   :  { %5259 = dma.done.wait [#allocation3], 16384  }
 0x1ea   :  { %5260 = vsyncadd [#allocation3], 4294950912 }
 0x1eb   :  { %3935 = vsyncpa [#allocation3], 1 }

</bundles_post_ra>
